<compile_context>
chip_gen: v5e
topology: v5e:2x2
jax: 0.10.0
libtpu: 0.0.40
codegen_flags: <defaults>
</compile_context>

<pallas_src>
import math
import functools

import jax
import jax.numpy as jnp
from jax.experimental import pallas as pl
from jax.experimental.pallas import tpu as pltpu


def _round_up(v, m):
    return ((v + m - 1) // m) * m


# ----------------------------- Pallas kernel ------------------------------- #

def cnn_fused_kernel(*refs, shifts, n_layers):
    """Fused CNNLayer forward for a tile of Bt samples (grid over B // Bt).

    refs = (x_ref, 8 params per layer ..., out_ref)
      per-layer params: w_conv (K*Cin_p, Cout_p) bf16, b_conv (1, Cout_p) f32,
                        w_res (Cin_p, Cout_p) bf16,  b_res (1, Cout_p) f32,
                        w1 (Cout_p, hid_p) f32,      w2 (hid_p, Cout_p) f32,
                        bn_scale (1, Cout_p) f32,    bn_shift (1, Cout_p) f32
    """
    x_ref, param_refs, out_ref = refs[0], refs[1:-1], refs[-1]
    Bt, L, _ = x_ref.shape
    R = Bt * L

    h3 = x_ref[...]                                    # (Bt, L, Cin) f32
    # Samples stacked on sublanes; L is a multiple of 8 so this merge is layout-free.
    h = h3.reshape(R, h3.shape[-1])                    # (R, Cin)

    # Within-sample row index, hoisted once; per-tap boundary masks implement the
    # 'same' zero padding and keep the sublane roll from crossing sample boundaries.
    pos = jax.lax.broadcasted_iota(jnp.int32, (R, 1), 0) % L
    masks = {s: (pos + s >= 0) & (pos + s < L) for s in shifts if s != 0}

    for i in range(n_layers):
        (wc_ref, bc_ref, wr_ref, br_ref,
         w1_ref, w2_ref, sc_ref, sh_ref) = param_refs[8 * i: 8 * i + 8]
        c_out = wc_ref.shape[1]

        # im2col taps: XLU sublane rotations + boundary masks; materialized in bf16.
        hb = h.astype(jnp.bfloat16)
        taps = []
        for s in shifts:
            if s == 0:
                taps.append(hb)
            else:
                rolled = pltpu.roll(h, (-s) % R, axis=0)   # out[l] = h[l + s]
                taps.append(jnp.where(masks[s], rolled, 0.0).astype(jnp.bfloat16))
        cols = jnp.concatenate(taps, axis=1)               # (R, K*Cin) bf16

        # Two MXU matmuls (conv + 1x1 residual), f32 accumulation, lane-dense outputs.
        conv = jnp.dot(cols, wc_ref[...],
                       preferred_element_type=jnp.float32) + bc_ref[...]   # (R, Cout_p)
        res = jnp.dot(hb, wr_ref[...],
                      preferred_element_type=jnp.float32) + br_ref[...]    # (R, Cout_p)

        # SE: per-sample squeeze over L + tiny excitation matmuls (kept in f32).
        conv3 = conv.reshape(Bt, L, c_out)
        y = jnp.mean(conv3, axis=1)                                        # (Bt, Cout_p)
        e = jnp.maximum(jnp.dot(y, w1_ref[...],
                                preferred_element_type=jnp.float32), 0.0)
        gate = jax.nn.sigmoid(jnp.dot(e, w2_ref[...],
                                      preferred_element_type=jnp.float32))

        # SE channel gate fused with the pre-folded eval-mode BN affine, then ReLU;
        # residual branch is added after the activation (matches the torch module).
        act3 = jnp.maximum(conv3 * (gate * sc_ref[...])[:, None, :] + sh_ref[...], 0.0)
        h3 = act3 + res.reshape(Bt, L, c_out)
        h = h3.reshape(R, c_out)
        # TODO(synk): nn.Dropout(0.1) is stochastic in train mode; identity here (eval).

    # Final torch.mean(x, dim=-1): per-sample mean over the sequence, written directly.
    out_ref[...] = jnp.mean(h3, axis=1, keepdims=True)     # (Bt, 1, C_last_p)


# ------------------------------- wrappers ---------------------------------- #

def _make_shifts(kernel_size, dilation):
    """Tap shifts of the torch padding='same' dilated conv."""
    total = dilation * (kernel_size - 1)
    pad_l = total // 2
    return [k * dilation - pad_l for k in range(kernel_size)]


def _pack_layer(p, c_in_p, c_out_p, hid_p):
    """Fold raw per-layer parameters into the fused-kernel, channel-padded form."""
    wc, bc, w1, w2, gamma, beta, rm, rv, wr, br = p
    K, c_in, c_out = wc.shape
    hid = w1.shape[1]

    # Conv taps stacked row-wise (tap-major), zero-padded to lane-dense widths.
    wc_p = jnp.zeros((K, c_in_p, c_out_p), jnp.float32).at[:, :c_in, :c_out].set(wc)
    wc_p = wc_p.reshape(K * c_in_p, c_out_p).astype(jnp.bfloat16)
    bc_p = jnp.zeros((1, c_out_p), jnp.float32).at[:, :c_out].set(bc)

    wr_p = jnp.zeros((c_in_p, c_out_p), jnp.float32).at[:c_in, :c_out].set(wr)
    wr_p = wr_p.astype(jnp.bfloat16)
    br_p = jnp.zeros((1, c_out_p), jnp.float32).at[:, :c_out].set(br)

    w1_p = jnp.zeros((c_out_p, hid_p), jnp.float32).at[:c_out, :hid].set(w1)
    w2_p = jnp.zeros((hid_p, c_out_p), jnp.float32).at[:hid, :c_out].set(w2)

    # Eval-mode BatchNorm folded to affine; padded channels get scale=shift=0 so they
    # stay exactly zero through ReLU / residual / the next layer.
    scale = gamma * jax.lax.rsqrt(rv + 1e-5)
    shift = beta - rm * scale
    sc_p = jnp.zeros((1, c_out_p), jnp.float32).at[:, :c_out].set(scale)
    sh_p = jnp.zeros((1, c_out_p), jnp.float32).at[:, :c_out].set(shift)
    return (wc_p, bc_p, wr_p, br_p, w1_p, w2_p, sc_p, sh_p)


def _pick_bt(B, L, cins_p, couts_p, K, vmem_budget_bytes):
    """Samples per grid step: fill >=256 MXU rows, keep >=2 grid tiles (v7x has 2 TCs),
    stay inside the VMEM budget, and divide B evenly."""
    target = max(1, pl.cdiv(256, L))
    if B >= 2:
        target = min(target, max(1, B // 2))
    target = max(1, min(target, B))
    # rough live bytes / sample for the worst layer: f32 act + bf16 taps/cols
    # + f32 conv/res/act accumulators.
    per_sample = 1
    for cin, cout in zip(cins_p, couts_p):
        per_sample = max(per_sample, L * (4 * cin + 2 * (K + 1) * cin + 12 * cout))
    target = min(target, max(1, vmem_budget_bytes // (2 * per_sample)))
    bt = max(1, target)
    while B % bt:
        bt -= 1
    return bt


def cnn_layer_forward(x, params, kernel_size, dilation):
    """x: (B, L, in_ch) f32 -> (B, features[-1]) f32  (== torch CNNLayer.forward)."""
    B, L, in_ch = x.shape
    shifts = tuple(_make_shifts(kernel_size, dilation))

    couts = [p[0].shape[-1] for p in params]
    couts_p = [_round_up(c, 128) for c in couts]                 # lane-dense channels
    hids_p = [_round_up(max(p[2].shape[1], 1), 128) for p in params]
    cins_p = [in_ch] + couts_p[:-1]

    packed = [_pack_layer(p, ci, co, hi)
              for p, ci, co, hi in zip(params, cins_p, couts_p, hids_p)]

    # VMEM budget sized against v7x's 64 MiB physical VMEM (about half of v5e/v6e);
    # constant-index weights are double-buffered by default, so reserve 2x for them.
    vmem_limit = 48 * 1024 * 1024
    param_bytes = sum(int(a.size) * a.dtype.itemsize for lp in packed for a in lp)
    bt = _pick_bt(B, L, cins_p, couts_p, kernel_size,
                  vmem_budget_bytes=max(vmem_limit - 2 * param_bytes, 4 * 1024 * 1024))
    assert B % bt == 0

    flat = []
    in_specs = [pl.BlockSpec((bt, L, in_ch), lambda b: (b, 0, 0))]
    for lp in packed:
        for arr in lp:
            flat.append(arr)
            # Constant block index: never re-fetched across the grid (still counted 2x
            # in the VMEM budget above; pl.Buffered(1) omitted for portability).
            in_specs.append(
                pl.BlockSpec(arr.shape, lambda b, _z=(0,) * arr.ndim: _z))

    c_last, c_last_p = couts[-1], couts_p[-1]
    kern = functools.partial(cnn_fused_kernel, shifts=shifts, n_layers=len(params))
    out = pl.pallas_call(
        kern,
        grid=(B // bt,),
        out_shape=jax.ShapeDtypeStruct((B, 1, c_last_p), jnp.float32),
        in_specs=in_specs,
        out_specs=pl.BlockSpec((bt, 1, c_last_p), lambda b: (b, 0, 0)),
        compiler_params=pltpu.CompilerParams(
            dimension_semantics=("parallel",),
            vmem_limit_bytes=vmem_limit),
    )(x, *flat)
    return out.reshape(B, c_last_p)[:, :c_last]


# --------------------------- parameter creation ----------------------------- #

def init_params(key, in_ch, features, kernel_size, r=16):
    params = []
    c_in = in_ch
    for c_out in features:
        key, k0, k1, k2, k3, k4, k5 = jax.random.split(key, 7)
        hid = c_out // r
        b_conv = 1.0 / math.sqrt(c_in * kernel_size)
        wc = jax.random.uniform(k0, (kernel_size, c_in, c_out), jnp.float32, -b_conv, b_conv)
        bc = jax.random.uniform(k1, (1, c_out), jnp.float32, -b_conv, b_conv)
        w1 = jax.random.uniform(k2, (c_out, hid), jnp.float32,
                                -1.0 / math.sqrt(c_out), 1.0 / math.sqrt(c_out))
        w2 = jax.random.uniform(k3, (hid, c_out), jnp.float32,
                                -1.0 / math.sqrt(hid), 1.0 / math.sqrt(hid))
        gamma = jnp.ones((1, c_out), jnp.float32)          # BatchNorm1d init
        beta = jnp.zeros((1, c_out), jnp.float32)
        rm = jnp.zeros((1, c_out), jnp.float32)
        rv = jnp.ones((1, c_out), jnp.float32)
        b_res = 1.0 / math.sqrt(c_in)
        wr = jax.random.uniform(k4, (c_in, c_out), jnp.float32, -b_res, b_res)
        br = jax.random.uniform(k5, (1, c_out), jnp.float32, -b_res, b_res)
        params.append((wc, bc, w1, w2, gamma, beta, rm, rv, wr, br))
        c_in = c_out
    return params


# ---------------------------- plain-JAX reference --------------------------- #

def _ref_conv_block(x, params, kernel_size, dilation):
    wc, bc, w1, w2, gamma, beta, rm, rv, wr, br = params
    B, L, _ = x.shape
    Cout = wc.shape[-1]
    total = dilation * (kernel_size - 1)
    pad_l = total // 2
    xpad = jnp.pad(x, ((0, 0), (pad_l, total - pad_l), (0, 0)))
    acc = jnp.zeros((B, L, Cout), jnp.float32)
    for k in range(kernel_size):
        xs = xpad[:, k * dilation: k * dilation + L, :]
        acc = acc + jnp.einsum('blc,co->blo', xs, wc[k], precision=jax.lax.Precision.HIGHEST)
    conv = acc + bc
    y = jnp.mean(conv, axis=1)
    h = jnp.maximum(jnp.einsum('bc,ch->bh', y, w1, precision=jax.lax.Precision.HIGHEST), 0.0)
    s = jax.nn.sigmoid(jnp.einsum('bh,hc->bc', h, w2, precision=jax.lax.Precision.HIGHEST))
    se = conv * s[:, None, :]
    bn = (se - rm) * (gamma / jnp.sqrt(rv + 1e-5)) + beta
    act = jnp.maximum(bn, 0.0)
    res = jnp.einsum('blc,co->blo', x, wr, precision=jax.lax.Precision.HIGHEST) + br
    return act + res


def _ref_forward(x, all_params, kernel_size, dilation):
    h = x
    for p in all_params:
        h = _ref_conv_block(h, p, kernel_size, dilation)
    return jnp.mean(h, axis=1)


# ---------------------------------- main ------------------------------------ #

if __name__ == "__main__":
    # config: in_ch=4, features=[32, 64], kernel_size=3, dilation=2
    B, L, in_ch = 8, 16, 4
    features = [32, 64]
    kernel_size = 3
    dilation = 2

    key = jax.random.PRNGKey(0)
    kx, kp = jax.random.split(key)
    x = jax.random.normal(kx, (B, L, in_ch), jnp.float32)   # torch input (B, L, C_in)
    params = init_params(kp, in_ch, features, kernel_size)

    out = cnn_layer_forward(x, params, kernel_size, dilation)
    out = jax.block_until_ready(out)

    assert out.shape == (B, features[-1]), out.shape
    assert bool(jnp.all(jnp.isfinite(out)))

    ref = _ref_forward(x, params, kernel_size, dilation)
    assert bool(jnp.allclose(out, ref, rtol=2e-2, atol=2e-2)), (
        float(jnp.max(jnp.abs(out - ref))))

    print("KERNEL_OK")
</pallas_src>

<mosaic_0001>
module attributes {stable_mosaic.version = 11 : i64} {
  func.func @cnn_fused_kernel(%arg0: i32, %arg1: memref<4x16x4xf32, #tpu.memory_space<vmem>>, %arg2: memref<12x128xbf16, #tpu.memory_space<vmem>>, %arg3: memref<1x128xf32, #tpu.memory_space<vmem>>, %arg4: memref<4x128xbf16, #tpu.memory_space<vmem>>, %arg5: memref<1x128xf32, #tpu.memory_space<vmem>>, %arg6: memref<128x128xf32, #tpu.memory_space<vmem>>, %arg7: memref<128x128xf32, #tpu.memory_space<vmem>>, %arg8: memref<1x128xf32, #tpu.memory_space<vmem>>, %arg9: memref<1x128xf32, #tpu.memory_space<vmem>>, %arg10: memref<384x128xbf16, #tpu.memory_space<vmem>>, %arg11: memref<1x128xf32, #tpu.memory_space<vmem>>, %arg12: memref<128x128xbf16, #tpu.memory_space<vmem>>, %arg13: memref<1x128xf32, #tpu.memory_space<vmem>>, %arg14: memref<128x128xf32, #tpu.memory_space<vmem>>, %arg15: memref<128x128xf32, #tpu.memory_space<vmem>>, %arg16: memref<1x128xf32, #tpu.memory_space<vmem>>, %arg17: memref<1x128xf32, #tpu.memory_space<vmem>>, %arg18: memref<4x1x128xf32, #tpu.memory_space<vmem>>) attributes {dimension_semantics = [#tpu.dimension_semantics<parallel>], iteration_bounds = array<i64: 2>, scalar_prefetch = 0 : i64, scratch_operands = 0 : i64, tpu.core_type = #tpu.core_type<tc>, window_params = [{transform_indices = @transform_0, window_bounds = array<i64: 4, 16, 4>}, {pipeline_mode = #tpu.pipeline_mode<synchronous>, transform_indices = @transform_1, window_bounds = array<i64: 12, 128>}, {pipeline_mode = #tpu.pipeline_mode<synchronous>, transform_indices = @transform_2, window_bounds = array<i64: 1, 128>}, {pipeline_mode = #tpu.pipeline_mode<synchronous>, transform_indices = @transform_3, window_bounds = array<i64: 4, 128>}, {pipeline_mode = #tpu.pipeline_mode<synchronous>, transform_indices = @transform_4, window_bounds = array<i64: 1, 128>}, {pipeline_mode = #tpu.pipeline_mode<synchronous>, transform_indices = @transform_5, window_bounds = array<i64: 128, 128>}, {pipeline_mode = #tpu.pipeline_mode<synchronous>, transform_indices = @transform_6, window_bounds = array<i64: 128, 128>}, {pipeline_mode = #tpu.pipeline_mode<synchronous>, transform_indices = @transform_7, window_bounds = array<i64: 1, 128>}, {pipeline_mode = #tpu.pipeline_mode<synchronous>, transform_indices = @transform_8, window_bounds = array<i64: 1, 128>}, {pipeline_mode = #tpu.pipeline_mode<synchronous>, transform_indices = @transform_9, window_bounds = array<i64: 384, 128>}, {pipeline_mode = #tpu.pipeline_mode<synchronous>, transform_indices = @transform_10, window_bounds = array<i64: 1, 128>}, {pipeline_mode = #tpu.pipeline_mode<synchronous>, transform_indices = @transform_11, window_bounds = array<i64: 128, 128>}, {pipeline_mode = #tpu.pipeline_mode<synchronous>, transform_indices = @transform_12, window_bounds = array<i64: 1, 128>}, {pipeline_mode = #tpu.pipeline_mode<synchronous>, transform_indices = @transform_13, window_bounds = array<i64: 128, 128>}, {pipeline_mode = #tpu.pipeline_mode<synchronous>, transform_indices = @transform_14, window_bounds = array<i64: 128, 128>}, {pipeline_mode = #tpu.pipeline_mode<synchronous>, transform_indices = @transform_15, window_bounds = array<i64: 1, 128>}, {pipeline_mode = #tpu.pipeline_mode<synchronous>, transform_indices = @transform_16, window_bounds = array<i64: 1, 128>}, {transform_indices = @transform_17, window_bounds = array<i64: 4, 1, 128>}]} {
    %c0 = arith.constant 0 : index
    %c0_0 = arith.constant 0 : index
    %c0_1 = arith.constant 0 : index
    %0 = vector.load %arg1[%c0, %c0_0, %c0_1] : memref<4x16x4xf32, #tpu.memory_space<vmem>>, vector<4x16x4xf32>
    %1 = vector.shape_cast %0 : vector<4x16x4xf32> to vector<64x4xf32>
    %2 = tpu.iota {dimensions = array<i32: 0>} : vector<64x1xi32>
    %c16_i32 = arith.constant 16 : i32
    %c0_i32 = arith.constant 0 : i32
    %3 = arith.cmpi eq, %c16_i32, %c0_i32 : i32
    %c1_i32 = arith.constant 1 : i32
    %4 = arith.select %3, %c1_i32, %c16_i32 : i32
    %5 = vector.broadcast %4 : i32 to vector<64x1xi32>
    %6 = arith.remsi %2, %5 : vector<64x1xi32>
    %c0_i32_2 = arith.constant 0 : i32
    %7 = vector.broadcast %c0_i32_2 : i32 to vector<64x1xi32>
    %8 = arith.cmpi ne, %6, %7 : vector<64x1xi32>
    %c0_i32_3 = arith.constant 0 : i32
    %9 = vector.broadcast %c0_i32_3 : i32 to vector<64x1xi32>
    %10 = arith.cmpi slt, %6, %9 : vector<64x1xi32>
    %c0_i32_4 = arith.constant 0 : i32
    %11 = arith.cmpi slt, %4, %c0_i32_4 : i32
    %12 = vector.broadcast %11 : i1 to vector<64x1xi1>
    %13 = vector.broadcast %12 : vector<64x1xi1> to vector<64x1xi1>
    %14 = arith.xori %10, %13 : vector<64x1xi1>
    %15 = arith.andi %14, %8 : vector<64x1xi1>
    %16 = vector.broadcast %4 : i32 to vector<64x1xi32>
    %17 = arith.addi %6, %16 : vector<64x1xi32>
    %18 = arith.select %15, %17, %6 : vector<64x1xi1>, vector<64x1xi32>
    %c-2_i32 = arith.constant -2 : i32
    %19 = vector.broadcast %c-2_i32 : i32 to vector<64x1xi32>
    %20 = arith.addi %18, %19 : vector<64x1xi32>
    %c0_i32_5 = arith.constant 0 : i32
    %21 = vector.broadcast %c0_i32_5 : i32 to vector<64x1xi32>
    %22 = arith.cmpi sge, %20, %21 : vector<64x1xi32>
    %c-2_i32_6 = arith.constant -2 : i32
    %23 = vector.broadcast %c-2_i32_6 : i32 to vector<64x1xi32>
    %24 = arith.addi %18, %23 : vector<64x1xi32>
    %c16_i32_7 = arith.constant 16 : i32
    %25 = vector.broadcast %c16_i32_7 : i32 to vector<64x1xi32>
    %26 = arith.cmpi slt, %24, %25 : vector<64x1xi32>
    %27 = arith.andi %22, %26 : vector<64x1xi1>
    %c2_i32 = arith.constant 2 : i32
    %28 = vector.broadcast %c2_i32 : i32 to vector<64x1xi32>
    %29 = arith.addi %18, %28 : vector<64x1xi32>
    %c0_i32_8 = arith.constant 0 : i32
    %30 = vector.broadcast %c0_i32_8 : i32 to vector<64x1xi32>
    %31 = arith.cmpi sge, %29, %30 : vector<64x1xi32>
    %c2_i32_9 = arith.constant 2 : i32
    %32 = vector.broadcast %c2_i32_9 : i32 to vector<64x1xi32>
    %33 = arith.addi %18, %32 : vector<64x1xi32>
    %c16_i32_10 = arith.constant 16 : i32
    %34 = vector.broadcast %c16_i32_10 : i32 to vector<64x1xi32>
    %35 = arith.cmpi slt, %33, %34 : vector<64x1xi32>
    %36 = arith.andi %31, %35 : vector<64x1xi1>
    %37 = arith.truncf %1 : vector<64x4xf32> to vector<64x4xbf16>
    %c2_i32_11 = arith.constant 2 : i32
    %38 = tpu.dynamic_rotate %1 by %c2_i32_11 dim 0 : vector<64x4xf32>, i32 -> vector<64x4xf32>
    %cst = arith.constant 0.000000e+00 : f32
    %39 = vector.shape_cast %27 : vector<64x1xi1> to vector<64x1xi1>
    %40 = vector.broadcast %39 : vector<64x1xi1> to vector<64x4xi1>
    %41 = vector.broadcast %cst : f32 to vector<64x4xf32>
    %42 = arith.select %40, %38, %41 : vector<64x4xi1>, vector<64x4xf32>
    %43 = arith.truncf %42 : vector<64x4xf32> to vector<64x4xbf16>
    %c62_i32 = arith.constant 62 : i32
    %44 = tpu.dynamic_rotate %1 by %c62_i32 dim 0 : vector<64x4xf32>, i32 -> vector<64x4xf32>
    %cst_12 = arith.constant 0.000000e+00 : f32
    %45 = vector.shape_cast %36 : vector<64x1xi1> to vector<64x1xi1>
    %46 = vector.broadcast %45 : vector<64x1xi1> to vector<64x4xi1>
    %47 = vector.broadcast %cst_12 : f32 to vector<64x4xf32>
    %48 = arith.select %46, %44, %47 : vector<64x4xi1>, vector<64x4xf32>
    %49 = arith.truncf %48 : vector<64x4xf32> to vector<64x4xbf16>
    %50 = tpu.concatenate %43, %37, %49 in 1 : vector<64x4xbf16>, vector<64x4xbf16>, vector<64x4xbf16> -> vector<64x12xbf16>
    %c0_13 = arith.constant 0 : index
    %c0_14 = arith.constant 0 : index
    %51 = vector.load %arg2[%c0_13, %c0_14] : memref<12x128xbf16, #tpu.memory_space<vmem>>, vector<12x128xbf16>
    %cst_15 = arith.constant dense<0.000000e+00> : vector<64x128xf32>
    %52 = tpu.matmul %50, %51, %cst_15 {dimension_numbers = #tpu.dot_dimension_numbers<[1], [0], [0], [1], [0, 0, 1, 1], [], []>} : vector<64x12xbf16>, vector<12x128xbf16>, vector<64x128xf32> -> vector<64x128xf32>
    %c0_16 = arith.constant 0 : index
    %c0_17 = arith.constant 0 : index
    %53 = vector.load %arg3[%c0_16, %c0_17] : memref<1x128xf32, #tpu.memory_space<vmem>>, vector<1x128xf32>
    %54 = vector.broadcast %53 : vector<1x128xf32> to vector<64x128xf32>
    %55 = arith.addf %52, %54 : vector<64x128xf32>
    %c0_18 = arith.constant 0 : index
    %c0_19 = arith.constant 0 : index
    %56 = vector.load %arg4[%c0_18, %c0_19] : memref<4x128xbf16, #tpu.memory_space<vmem>>, vector<4x128xbf16>
    %cst_20 = arith.constant dense<0.000000e+00> : vector<64x128xf32>
    %57 = tpu.matmul %37, %56, %cst_20 {dimension_numbers = #tpu.dot_dimension_numbers<[1], [0], [0], [1], [0, 0, 1, 1], [], []>} : vector<64x4xbf16>, vector<4x128xbf16>, vector<64x128xf32> -> vector<64x128xf32>
    %c0_21 = arith.constant 0 : index
    %c0_22 = arith.constant 0 : index
    %58 = vector.load %arg5[%c0_21, %c0_22] : memref<1x128xf32, #tpu.memory_space<vmem>>, vector<1x128xf32>
    %59 = vector.broadcast %58 : vector<1x128xf32> to vector<64x128xf32>
    %60 = arith.addf %57, %59 : vector<64x128xf32>
    %61 = vector.shape_cast %55 : vector<64x128xf32> to vector<4x16x128xf32>
    %cst_23 = arith.constant dense<0.000000e+00> : vector<4x128xf32>
    %62 = vector.multi_reduction <add>, %61, %cst_23 [1] : vector<4x16x128xf32> to vector<4x128xf32>
    %cst_24 = arith.constant 1.600000e+01 : f32
    %63 = vector.broadcast %cst_24 : f32 to vector<4x128xf32>
    %64 = arith.divf %62, %63 : vector<4x128xf32>
    %c0_25 = arith.constant 0 : index
    %c0_26 = arith.constant 0 : index
    %65 = vector.load %arg6[%c0_25, %c0_26] : memref<128x128xf32, #tpu.memory_space<vmem>>, vector<128x128xf32>
    %cst_27 = arith.constant dense<0.000000e+00> : vector<4x128xf32>
    %66 = tpu.matmul %64, %65, %cst_27 {dimension_numbers = #tpu.dot_dimension_numbers<[1], [0], [0], [1], [0, 0, 1, 1], [], []>} : vector<4x128xf32>, vector<128x128xf32>, vector<4x128xf32> -> vector<4x128xf32>
    %cst_28 = arith.constant 0.000000e+00 : f32
    %67 = vector.broadcast %cst_28 : f32 to vector<4x128xf32>
    %68 = arith.maximumf %66, %67 : vector<4x128xf32>
    %c0_29 = arith.constant 0 : index
    %c0_30 = arith.constant 0 : index
    %69 = vector.load %arg7[%c0_29, %c0_30] : memref<128x128xf32, #tpu.memory_space<vmem>>, vector<128x128xf32>
    %cst_31 = arith.constant dense<0.000000e+00> : vector<4x128xf32>
    %70 = tpu.matmul %68, %69, %cst_31 {dimension_numbers = #tpu.dot_dimension_numbers<[1], [0], [0], [1], [0, 0, 1, 1], [], []>} : vector<4x128xf32>, vector<128x128xf32>, vector<4x128xf32> -> vector<4x128xf32>
    %71 = arith.negf %70 : vector<4x128xf32>
    %72 = math.exp %71 : vector<4x128xf32>
    %cst_32 = arith.constant 1.000000e+00 : f32
    %73 = vector.broadcast %cst_32 : f32 to vector<4x128xf32>
    %74 = arith.addf %73, %72 : vector<4x128xf32>
    %75 = arith.divf %73, %74 : vector<4x128xf32>
    %c0_33 = arith.constant 0 : index
    %c0_34 = arith.constant 0 : index
    %76 = vector.load %arg8[%c0_33, %c0_34] : memref<1x128xf32, #tpu.memory_space<vmem>>, vector<1x128xf32>
    %77 = vector.broadcast %76 : vector<1x128xf32> to vector<4x128xf32>
    %78 = arith.mulf %75, %77 : vector<4x128xf32>
    %79 = vector.shape_cast %78 : vector<4x128xf32> to vector<4x1x128xf32>
    %80 = vector.broadcast %79 : vector<4x1x128xf32> to vector<4x16x128xf32>
    %81 = arith.mulf %61, %80 : vector<4x16x128xf32>
    %c0_35 = arith.constant 0 : index
    %c0_36 = arith.constant 0 : index
    %82 = vector.load %arg9[%c0_35, %c0_36] : memref<1x128xf32, #tpu.memory_space<vmem>>, vector<1x128xf32>
    %83 = vector.shape_cast %82 : vector<1x128xf32> to vector<1x1x128xf32>
    %84 = vector.broadcast %83 : vector<1x1x128xf32> to vector<4x16x128xf32>
    %85 = arith.addf %81, %84 : vector<4x16x128xf32>
    %cst_37 = arith.constant 0.000000e+00 : f32
    %86 = vector.broadcast %cst_37 : f32 to vector<4x16x128xf32>
    %87 = arith.maximumf %85, %86 : vector<4x16x128xf32>
    %88 = vector.shape_cast %60 : vector<64x128xf32> to vector<4x16x128xf32>
    %89 = arith.addf %87, %88 : vector<4x16x128xf32>
    %90 = vector.shape_cast %89 : vector<4x16x128xf32> to vector<64x128xf32>
    %91 = arith.truncf %90 : vector<64x128xf32> to vector<64x128xbf16>
    %c2_i32_38 = arith.constant 2 : i32
    %92 = tpu.dynamic_rotate %90 by %c2_i32_38 dim 0 : vector<64x128xf32>, i32 -> vector<64x128xf32>
    %cst_39 = arith.constant 0.000000e+00 : f32
    %93 = vector.shape_cast %27 : vector<64x1xi1> to vector<64x1xi1>
    %94 = vector.broadcast %93 : vector<64x1xi1> to vector<64x128xi1>
    %95 = vector.broadcast %cst_39 : f32 to vector<64x128xf32>
    %96 = arith.select %94, %92, %95 : vector<64x128xi1>, vector<64x128xf32>
    %97 = arith.truncf %96 : vector<64x128xf32> to vector<64x128xbf16>
    %c62_i32_40 = arith.constant 62 : i32
    %98 = tpu.dynamic_rotate %90 by %c62_i32_40 dim 0 : vector<64x128xf32>, i32 -> vector<64x128xf32>
    %cst_41 = arith.constant 0.000000e+00 : f32
    %99 = vector.shape_cast %36 : vector<64x1xi1> to vector<64x1xi1>
    %100 = vector.broadcast %99 : vector<64x1xi1> to vector<64x128xi1>
    %101 = vector.broadcast %cst_41 : f32 to vector<64x128xf32>
    %102 = arith.select %100, %98, %101 : vector<64x128xi1>, vector<64x128xf32>
    %103 = arith.truncf %102 : vector<64x128xf32> to vector<64x128xbf16>
    %104 = tpu.concatenate %97, %91, %103 in 1 : vector<64x128xbf16>, vector<64x128xbf16>, vector<64x128xbf16> -> vector<64x384xbf16>
    %c0_42 = arith.constant 0 : index
    %c0_43 = arith.constant 0 : index
    %105 = vector.load %arg10[%c0_42, %c0_43] : memref<384x128xbf16, #tpu.memory_space<vmem>>, vector<384x128xbf16>
    %cst_44 = arith.constant dense<0.000000e+00> : vector<64x128xf32>
    %106 = tpu.matmul %104, %105, %cst_44 {dimension_numbers = #tpu.dot_dimension_numbers<[1], [0], [0], [1], [0, 0, 1, 1], [], []>} : vector<64x384xbf16>, vector<384x128xbf16>, vector<64x128xf32> -> vector<64x128xf32>
    %c0_45 = arith.constant 0 : index
    %c0_46 = arith.constant 0 : index
    %107 = vector.load %arg11[%c0_45, %c0_46] : memref<1x128xf32, #tpu.memory_space<vmem>>, vector<1x128xf32>
    %108 = vector.broadcast %107 : vector<1x128xf32> to vector<64x128xf32>
    %109 = arith.addf %106, %108 : vector<64x128xf32>
    %c0_47 = arith.constant 0 : index
    %c0_48 = arith.constant 0 : index
    %110 = vector.load %arg12[%c0_47, %c0_48] : memref<128x128xbf16, #tpu.memory_space<vmem>>, vector<128x128xbf16>
    %cst_49 = arith.constant dense<0.000000e+00> : vector<64x128xf32>
    %111 = tpu.matmul %91, %110, %cst_49 {dimension_numbers = #tpu.dot_dimension_numbers<[1], [0], [0], [1], [0, 0, 1, 1], [], []>} : vector<64x128xbf16>, vector<128x128xbf16>, vector<64x128xf32> -> vector<64x128xf32>
    %c0_50 = arith.constant 0 : index
    %c0_51 = arith.constant 0 : index
    %112 = vector.load %arg13[%c0_50, %c0_51] : memref<1x128xf32, #tpu.memory_space<vmem>>, vector<1x128xf32>
    %113 = vector.broadcast %112 : vector<1x128xf32> to vector<64x128xf32>
    %114 = arith.addf %111, %113 : vector<64x128xf32>
    %115 = vector.shape_cast %109 : vector<64x128xf32> to vector<4x16x128xf32>
    %cst_52 = arith.constant dense<0.000000e+00> : vector<4x128xf32>
    %116 = vector.multi_reduction <add>, %115, %cst_52 [1] : vector<4x16x128xf32> to vector<4x128xf32>
    %cst_53 = arith.constant 1.600000e+01 : f32
    %117 = vector.broadcast %cst_53 : f32 to vector<4x128xf32>
    %118 = arith.divf %116, %117 : vector<4x128xf32>
    %c0_54 = arith.constant 0 : index
    %c0_55 = arith.constant 0 : index
    %119 = vector.load %arg14[%c0_54, %c0_55] : memref<128x128xf32, #tpu.memory_space<vmem>>, vector<128x128xf32>
    %cst_56 = arith.constant dense<0.000000e+00> : vector<4x128xf32>
    %120 = tpu.matmul %118, %119, %cst_56 {dimension_numbers = #tpu.dot_dimension_numbers<[1], [0], [0], [1], [0, 0, 1, 1], [], []>} : vector<4x128xf32>, vector<128x128xf32>, vector<4x128xf32> -> vector<4x128xf32>
    %cst_57 = arith.constant 0.000000e+00 : f32
    %121 = vector.broadcast %cst_57 : f32 to vector<4x128xf32>
    %122 = arith.maximumf %120, %121 : vector<4x128xf32>
    %c0_58 = arith.constant 0 : index
    %c0_59 = arith.constant 0 : index
    %123 = vector.load %arg15[%c0_58, %c0_59] : memref<128x128xf32, #tpu.memory_space<vmem>>, vector<128x128xf32>
    %cst_60 = arith.constant dense<0.000000e+00> : vector<4x128xf32>
    %124 = tpu.matmul %122, %123, %cst_60 {dimension_numbers = #tpu.dot_dimension_numbers<[1], [0], [0], [1], [0, 0, 1, 1], [], []>} : vector<4x128xf32>, vector<128x128xf32>, vector<4x128xf32> -> vector<4x128xf32>
    %125 = arith.negf %124 : vector<4x128xf32>
    %126 = math.exp %125 : vector<4x128xf32>
    %cst_61 = arith.constant 1.000000e+00 : f32
    %127 = vector.broadcast %cst_61 : f32 to vector<4x128xf32>
    %128 = arith.addf %127, %126 : vector<4x128xf32>
    %129 = arith.divf %127, %128 : vector<4x128xf32>
    %c0_62 = arith.constant 0 : index
    %c0_63 = arith.constant 0 : index
    %130 = vector.load %arg16[%c0_62, %c0_63] : memref<1x128xf32, #tpu.memory_space<vmem>>, vector<1x128xf32>
    %131 = vector.broadcast %130 : vector<1x128xf32> to vector<4x128xf32>
    %132 = arith.mulf %129, %131 : vector<4x128xf32>
    %133 = vector.shape_cast %132 : vector<4x128xf32> to vector<4x1x128xf32>
    %134 = vector.broadcast %133 : vector<4x1x128xf32> to vector<4x16x128xf32>
    %135 = arith.mulf %115, %134 : vector<4x16x128xf32>
    %c0_64 = arith.constant 0 : index
    %c0_65 = arith.constant 0 : index
    %136 = vector.load %arg17[%c0_64, %c0_65] : memref<1x128xf32, #tpu.memory_space<vmem>>, vector<1x128xf32>
    %137 = vector.shape_cast %136 : vector<1x128xf32> to vector<1x1x128xf32>
    %138 = vector.broadcast %137 : vector<1x1x128xf32> to vector<4x16x128xf32>
    %139 = arith.addf %135, %138 : vector<4x16x128xf32>
    %cst_66 = arith.constant 0.000000e+00 : f32
    %140 = vector.broadcast %cst_66 : f32 to vector<4x16x128xf32>
    %141 = arith.maximumf %139, %140 : vector<4x16x128xf32>
    %142 = vector.shape_cast %114 : vector<64x128xf32> to vector<4x16x128xf32>
    %143 = arith.addf %141, %142 : vector<4x16x128xf32>
    %cst_67 = arith.constant dense<0.000000e+00> : vector<4x128xf32>
    %144 = vector.multi_reduction <add>, %143, %cst_67 [1] : vector<4x16x128xf32> to vector<4x128xf32>
    %145 = vector.shape_cast %144 : vector<4x128xf32> to vector<4x1x128xf32>
    %cst_68 = arith.constant 1.600000e+01 : f32
    %146 = vector.broadcast %cst_68 : f32 to vector<4x1x128xf32>
    %147 = arith.divf %145, %146 : vector<4x1x128xf32>
    %c0_69 = arith.constant 0 : index
    %c0_70 = arith.constant 0 : index
    %c0_71 = arith.constant 0 : index
    %148 = vector.load %arg18[%c0_69, %c0_70, %c0_71] : memref<4x1x128xf32, #tpu.memory_space<vmem>>, vector<4x1x128xf32>
    tpu.vector_store %arg18[%c0_69, %c0_70, %c0_71], %147 {strides = array<i32>} : memref<4x1x128xf32, #tpu.memory_space<vmem>>, vector<4x1x128xf32>,
    return
  }
  func.func @transform_0(%arg0: i32) -> (i32, i32, i32) {
    %c0_i32 = arith.constant 0 : i32
    %c0_i32_0 = arith.constant 0 : i32
    %c0_i32_1 = arith.constant 0 : i32
    return %arg0, %c0_i32, %c0_i32_0 : i32, i32, i32
  }
  func.func @transform_1(%arg0: i32) -> (i32, i32) {
    %c0_i32 = arith.constant 0 : i32
    %c0_i32_0 = arith.constant 0 : i32
    %c0_i32_1 = arith.constant 0 : i32
    return %c0_i32, %c0_i32_0 : i32, i32
  }
  func.func @transform_2(%arg0: i32) -> (i32, i32) {
    %c0_i32 = arith.constant 0 : i32
    %c0_i32_0 = arith.constant 0 : i32
    %c0_i32_1 = arith.constant 0 : i32
    return %c0_i32, %c0_i32_0 : i32, i32
  }
  func.func @transform_3(%arg0: i32) -> (i32, i32) {
    %c0_i32 = arith.constant 0 : i32
    %c0_i32_0 = arith.constant 0 : i32
    %c0_i32_1 = arith.constant 0 : i32
    return %c0_i32, %c0_i32_0 : i32, i32
  }
  func.func @transform_4(%arg0: i32) -> (i32, i32) {
    %c0_i32 = arith.constant 0 : i32
    %c0_i32_0 = arith.constant 0 : i32
    %c0_i32_1 = arith.constant 0 : i32
    return %c0_i32, %c0_i32_0 : i32, i32
  }
  func.func @transform_5(%arg0: i32) -> (i32, i32) {
    %c0_i32 = arith.constant 0 : i32
    %c0_i32_0 = arith.constant 0 : i32
    %c0_i32_1 = arith.constant 0 : i32
    return %c0_i32, %c0_i32_0 : i32, i32
  }
  func.func @transform_6(%arg0: i32) -> (i32, i32) {
    %c0_i32 = arith.constant 0 : i32
    %c0_i32_0 = arith.constant 0 : i32
    %c0_i32_1 = arith.constant 0 : i32
    return %c0_i32, %c0_i32_0 : i32, i32
  }
  func.func @transform_7(%arg0: i32) -> (i32, i32) {
    %c0_i32 = arith.constant 0 : i32
    %c0_i32_0 = arith.constant 0 : i32
    %c0_i32_1 = arith.constant 0 : i32
    return %c0_i32, %c0_i32_0 : i32, i32
  }
  func.func @transform_8(%arg0: i32) -> (i32, i32) {
    %c0_i32 = arith.constant 0 : i32
    %c0_i32_0 = arith.constant 0 : i32
    %c0_i32_1 = arith.constant 0 : i32
    return %c0_i32, %c0_i32_0 : i32, i32
  }
  func.func @transform_9(%arg0: i32) -> (i32, i32) {
    %c0_i32 = arith.constant 0 : i32
    %c0_i32_0 = arith.constant 0 : i32
    %c0_i32_1 = arith.constant 0 : i32
    return %c0_i32, %c0_i32_0 : i32, i32
  }
  func.func @transform_10(%arg0: i32) -> (i32, i32) {
    %c0_i32 = arith.constant 0 : i32
    %c0_i32_0 = arith.constant 0 : i32
    %c0_i32_1 = arith.constant 0 : i32
    return %c0_i32, %c0_i32_0 : i32, i32
  }
  func.func @transform_11(%arg0: i32) -> (i32, i32) {
    %c0_i32 = arith.constant 0 : i32
    %c0_i32_0 = arith.constant 0 : i32
    %c0_i32_1 = arith.constant 0 : i32
    return %c0_i32, %c0_i32_0 : i32, i32
  }
  func.func @transform_12(%arg0: i32) -> (i32, i32) {
    %c0_i32 = arith.constant 0 : i32
    %c0_i32_0 = arith.constant 0 : i32
    %c0_i32_1 = arith.constant 0 : i32
    return %c0_i32, %c0_i32_0 : i32, i32
  }
  func.func @transform_13(%arg0: i32) -> (i32, i32) {
    %c0_i32 = arith.constant 0 : i32
    %c0_i32_0 = arith.constant 0 : i32
    %c0_i32_1 = arith.constant 0 : i32
    return %c0_i32, %c0_i32_0 : i32, i32
  }
  func.func @transform_14(%arg0: i32) -> (i32, i32) {
    %c0_i32 = arith.constant 0 : i32
    %c0_i32_0 = arith.constant 0 : i32
    %c0_i32_1 = arith.constant 0 : i32
    return %c0_i32, %c0_i32_0 : i32, i32
  }
  func.func @transform_15(%arg0: i32) -> (i32, i32) {
    %c0_i32 = arith.constant 0 : i32
    %c0_i32_0 = arith.constant 0 : i32
    %c0_i32_1 = arith.constant 0 : i32
    return %c0_i32, %c0_i32_0 : i32, i32
  }
  func.func @transform_16(%arg0: i32) -> (i32, i32) {
    %c0_i32 = arith.constant 0 : i32
    %c0_i32_0 = arith.constant 0 : i32
    %c0_i32_1 = arith.constant 0 : i32
    return %c0_i32, %c0_i32_0 : i32, i32
  }
  func.func @transform_17(%arg0: i32) -> (i32, i32, i32) {
    %c0_i32 = arith.constant 0 : i32
    %c0_i32_0 = arith.constant 0 : i32
    %c0_i32_1 = arith.constant 0 : i32
    return %arg0, %c0_i32, %c0_i32_0 : i32, i32, i32
  }
}

</mosaic_0001>

<bundles_post_ra>
// kernel: tpu_custom_call.1
= control target key start
LH: loop header
LB: loop body
LE: loop exit
PB: predicated region body
PF: predicated region fallthrough
CT: control target
= control target key end

     0   :  { %s3452_s0 = inlined_call_operand.vmem [shape: f32[8,16,4], index: 0, kind: input, shape index: {}]   ;;  %s3453_s1 = inlined_call_operand.vmem [shape: bf16[12,128], index: 1, kind: input, shape index: {}]   ;;  %s3454_s2 = inlined_call_operand.vmem [shape: f32[1,128], index: 2, kind: input, shape index: {}]   ;;  %s3455_s3 = inlined_call_operand.vmem [shape: bf16[4,128], index: 3, kind: input, shape index: {}]   ;;  %s3456_s4 = inlined_call_operand.vmem [shape: f32[1,128], index: 4, kind: input, shape index: {}]   ;;  %s3457_s5 = inlined_call_operand.vmem [shape: f32[128,128], index: 5, kind: input, shape index: {}]   ;;  %s3458_s6 = inlined_call_operand.hbm [shape: f32[128,128], index: 6, kind: input, shape index: {}]   ;;  %s3459_s7 = inlined_call_operand.vmem [shape: f32[1,128], index: 7, kind: input, shape index: {}]   ;;  %s3460_s8 = inlined_call_operand.vmem [shape: f32[1,128], index: 8, kind: input, shape index: {}]   ;;  %s3461_s9 = inlined_call_operand.hbm [shape: bf16[384,128], index: 9, kind: input, shape index: {}]   ;;  %s3462_s10 = inlined_call_operand.vmem [shape: f32[1,128], index: 10, kind: input, shape index: {}]   ;;  %s3463_s11 = inlined_call_operand.hbm [shape: bf16[128,128], index: 11, kind: input, shape index: {}]   ;;  %s3464_s12 = inlined_call_operand.vmem [shape: f32[1,128], index: 12, kind: input, shape index: {}]   ;;  %s3465_s13 = inlined_call_operand.hbm [shape: f32[128,128], index: 13, kind: input, shape index: {}]   ;;  %s3466_s14 = inlined_call_operand.hbm [shape: f32[128,128], index: 14, kind: input, shape index: {}]   ;;  %s3467_s15 = inlined_call_operand.vmem [shape: f32[1,128], index: 15, kind: input, shape index: {}]   ;;  %s3468_s16 = inlined_call_operand.vmem [shape: f32[1,128], index: 16, kind: input, shape index: {}]   ;;  %s3469_s17 = inlined_call_operand.hbm [shape: f32[8,1,128], index: 17, kind: output, shape index: {}]  }
   0x1   :  { %3483 = sst [smem:[#allocation24_spill]] %s3452_s0 }
   0x2   :  { %3484 = sst [smem:[#allocation25_spill]] %s3453_s1 }
   0x3   :  { %3485 = sst [smem:[#allocation26_spill]] %s3458_s6 }
   0x4   :  { %3486 = sst [smem:[#allocation27_spill]] %s3461_s9 }
   0x5   :  { %3487 = sst [smem:[#allocation28_spill]] %s3465_s13 }
   0x6   :  { %3488 = sst [smem:[#allocation29_spill]] %s3468_s16 }
   0x7   :  { %3489 = sst [smem:[#allocation30_spill]] %s3469_s17 }
   0x8   :  { %22 = vsyncpa [#allocation3], 0 }
   0x9   :  { %23 = vsyncpa [#allocation6], 0 }
   0xa   :  { %24 = vsyncpa [#allocation9], 0 }
   0xb   :  { %25 = vsyncpa [#allocation4], 0 }
   0xc   :  { %27 = vsyncpa [#allocation4 + $0x1], 0  ;;  %s2833_s24 = smov 0   ;;  %s2835_s25 = smov 0  }
   0xd   :  { %s2837_s26 = smov 0   ;;  %s2839_s27 = smov 0  }
   0xe LB: > { %3490 = sst [smem:[#allocation16_spill]] %s2715_s24  ;;  %s2854_s28 = sadd.s32 4294967295, %s2727_s27   ;;  %s2727_s27 = sphi %s2839_s27, %s3517_s27   ;;  %s2723_s26 = sphi %s2837_s26, %s3520_s26   ;;  %s2719_s25 = sphi %s2835_s25, %s3519_s25   ;;  %s2715_s24 = sphi %s2833_s24, %s3518_s24  }
   0xf   : > { %3491 = sst [smem:[#allocation17_spill]] %s2719_s25  ;;  %s2188_s29 = sadd.s32 4294967294, %s2727_s27  }
  0x10   : > { %3492 = sst [smem:[#allocation18_spill]] %s2723_s26  ;;  %s2858_s0 = sadd.s32 1, %s2727_s27  }
  0x11   : > { %3493 = sst [smem:[#allocation19_spill]] %s2727_s27  ;;  %s402_s30 = sadd.s32 1, %s2723_s26 }
  0x12   : > { %3494 = sst [smem:[#allocation20_spill]] %s2858_s0  ;;  %s399_s18 = ssub.s32 %s2727_s27, %s2858_s0 }
  0x13   : > { %p412_p0 = scmp.ne.s32.totalorder %s2723_s26, %s2719_s25  ;;  %p400_p1 = scmp.eq.s32.totalorder %s399_s18, 0 }
  0x14   : > { %p413_p2 = scmp.eq.s32.totalorder %s2854_s28, 1  ;;  %p418_p3 = scmp.ne.s32.totalorder %s2719_s25, %s2715_s24 }
  0x15   : > { %p419_p4 = scmp.eq.s32.totalorder %s2188_s29, 1  ;;  %p2189_p7 = scmp.ge.s32.totalorder %s2727_s27, 1 }
  0x16   : > { %s2869_s19 = scalar_select %p400_p1, %s2723_s26, %s402_s30  }
  0x17   : > { %p2871_p5 = por %p413_p2, %p412_p0  ;;  %p2875_p6 = por %p419_p4, %p418_p3 }
  0x18   : > { %3495 = sst [smem:[#allocation21_spill]] %s2869_s19  ;;  %p426_p8 = scmp.lt.s32.totalorder %s2727_s27, 3 }
  0x19   : > { %s3496_s1 = scalar_select %p2871_p5, 1, 0 }
  0x1a   : > { %s3498_s20 = scalar_select %p2875_p6, 1, 0 }
  0x1b   : > { %3497 = sst [smem:[#allocation22_spill]] %s3496_s1  ;;  %p2428_p9 = scmp.eq.s32.totalorder %s2854_s28, 0 }
  0x1c   : > { %3499 = sst [smem:[#allocation23_spill]] %s3498_s20  ;;  %p2882_p10 = pnand %p2189_p7, %p426_p8 }
  0x1d   : > { %s3501_s9 = sld [smem:[#allocation27_spill]]  ;;  %s2729_s30 = smov [#allocation5]  }
  0x1e   : > { %p2408_p11 = pneg %p2882_p10  ;;  %s474_s18 = sshll.u32 %s2729_s30, 4  ;;  %s475_s18 = int_to_ptr.vmem [resolvable:$true] %s474_s18 }
  0x1f   : > { %s3503_s13 = sld [smem:[#allocation28_spill]]  ;;  %s2730_s22 = smov 64  }
  0x20   : > { %p2893_p12 = pnand %p2428_p9, %p2408_p11  ;;  %s2731_s23 = smov 4  }
  0x21   : > { %s3504_s6 = sld [smem:[#allocation26_spill]]  ;;  %s2733_s17 = smov 128  }
  0x22   : > { %s2734_s26 = smov 8   ;;  %s489_s25 = sshll.u32 %s3463_s11, 4  ;;  %s490_s25 = int_to_ptr.hbm [resolvable:$true] %s489_s25 }
  0x23   : > { %s472_s29 = sshll.u32 %s3501_s9, 4  ;;  %s2732_s9 = smov [#allocation8]   ;;  %s473_s29 = int_to_ptr.hbm [resolvable:$true] %s472_s29 }
  0x24   : > { %2414 = dma.hbm_to_vmem [thread:$0]  (!%p2893_p12), %s473_s29, 3072, %s475_s18, [#allocation6], %s2730_s22, %s2730_s22, %s2731_s23  }
  0x25   : > { %s506_s20 = sshll.u32 %s3503_s13, 4  ;;  %s508_s30 = sshll.u32 %s2732_s9, 4  ;;  %s507_s20 = int_to_ptr.hbm [resolvable:$true] %s506_s20  ;;  %s509_s30 = int_to_ptr.vmem [resolvable:$true] %s508_s30 }
  0x26   : > { %2420 = dma.hbm_to_vmem [thread:$0]  (!%p2893_p12), %s507_s20, 2048, %s509_s30, [#allocation9], %s2733_s17, %s2733_s17, %s2734_s26  }
  0x27   : > { %s452_s1 = sshll.u32 %s3504_s6, 4  ;;  %s2735_s29 = smov [#allocation2]   ;;  %s453_s1 = int_to_ptr.hbm [resolvable:$true] %s452_s1 }
  0x28   : > { %s454_s18 = sshll.u32 %s2735_s29, 4  ;;  %s2736_s9 = smov [#allocation7]   ;;  %s455_s18 = int_to_ptr.vmem [resolvable:$true] %s454_s18 }
  0x29   : > { %2411 = dma.hbm_to_vmem [thread:$0]  (!%p2893_p12), %s453_s1, 2048, %s455_s18, [#allocation3], %s2733_s17, %s2733_s17, %s2734_s26  }
  0x2a   : > { %s491_s24 = sshll.u32 %s2736_s9, 4  ;;  %s520_s16 = sshll.u32 %s3466_s14, 4  ;;  %s492_s24 = int_to_ptr.vmem [resolvable:$true] %s491_s24  ;;  %s521_s16 = int_to_ptr.hbm [resolvable:$true] %s520_s16 }
  0x2b   : > { %2417 = dma.hbm_to_vmem [thread:$0]  (!%p2893_p12), %s490_s25, 1024, %s492_s24, [#allocation6], %s2730_s22, %s2730_s22, %s2731_s23  }
  0x2c   : > { %s2737_s20 = smov [#allocation10]   ;;  %554 = sbr.rel (%p2882_p10) target bundleno = 1252 (0x4e4), region = 88 }
  0x2d   : > { %s522_s13 = sshll.u32 %s2737_s20, 4  ;;  %s523_s13 = int_to_ptr.vmem [resolvable:$true] %s522_s13 }
  0x2e   : > { %2423 = dma.hbm_to_vmem [thread:$0]  (!%p2893_p12), %s521_s16, 2048, %s523_s13, [#allocation9], %s2733_s17, %s2733_s17, %s2734_s26  }
  0x31   : > { %2698 = dma.done.wait (%p2428_p9), [#allocation3], 2048  }
  0x32   : > { %2700 = vsyncadd (%p2428_p9), [#allocation3], 4294965248 }
  0x33   : > { %2702 = dma.done.wait (%p2428_p9), [#allocation6], 4096  }
  0x34   : > { %2704 = vsyncadd (%p2428_p9), [#allocation6], 4294963200 }
  0x35   : > { %2706 = dma.done.wait (%p2428_p9), [#allocation9], 4096  }
  0x36   : > { %2708 = vsyncadd (%p2428_p9), [#allocation9], 4294963200  ;;  %s2934_s6 = sshll.u32 %s2854_s28, 2  ;;  %v645_v0 = vlaneseq  ;;  %s3505_s19 = sld [smem:[#allocation24_spill]]  ;;  %vm1038_vm7 = vcmask 1045504   ;;  %vm996_vm10 = vcmask 31744  }
  0x37   : > { %p629_p13 = scmp.lt.s32.totalorder %s2934_s6, 7  ;;  %s2738_s21 = smov 4   ;;  %vm1009_vm11 = vcmask 64512   ;;  %vm1029_vm12 = vcmask 97280   ;;  %vm1088_vm14 = vcmask 1041408  }
  0x38   : > { %v2937_v1 = vshrl.u32 %v645_v0, 7  ;;  %s2739_s22 = smov 8   ;;  %s3506_s26 = sld [smem:[#allocation25_spill]] }
  0x39   : > { %s630_s16 = scalar_select %p629_p13, %s2934_s6, 7 }
  0x3a   : > { %v647_v2 = vadd.s32 8, %v2937_v1  ;;  %v649_v3 = vadd.s32 24, %v2937_v1  ;;  %v2943_v4 = vadd.s32 56, %v2937_v1  ;;  %v2946_v5 = vadd.s32 40, %v2937_v1  ;;  %s3509_s30 = sld [smem:[#allocation29_spill]] }
  0x3b   : > { %s2352_s17 = sshll.u32 %s630_s16, 4  ;;  %vm879_vm0 = vcmp.lt.s32.totalorder %v2937_v1, 6  ;;  %v658_v11 = vand.u32 15, %v2937_v1  ;;  %vm830_vm2 = vcmp.lt.s32.totalorder %v2937_v1, 2  ;;  %s3511_s27 = sld [smem:[#allocation30_spill]] }
  0x3c   : > { %s2951_s1 = scalar_lea.vmem %s3505_s19, %s2352_s17  ;;  %v665_v6 = vand.u32 15, %v647_v2  ;;  %v679_v10 = vand.u32 15, %v649_v3  ;;  %v707_v15 = vand.u32 15, %v2943_v4  ;;  %v693_v16 = vand.u32 15, %v2946_v5 }
  0x3d   : > { %v2954_v7 = vld [vmem:[%s2951_s1] sm:$0xff]  ;;  %v2957_v8 = vld [vmem:[%s2951_s1 + $0x8] sm:$0xff]  ;;  %v2960_v9 = vld [vmem:[%s2951_s1 + $0x10] sm:$0xff]  ;;  %v3022_v49 = vadd.s32 4294967294, %v658_v11 }
  0x3e   : > { %v814_v12 = vpack.c.bf16 %v2954_v7, %v2954_v7  ;;  %v815_v13 = vpack.c.bf16 %v2957_v8, %v2957_v8  ;;  %v2969_v14 = vld [vmem:[%s2951_s1 + $0x18] sm:$0xff]  ;;  %v871_v17 = vrot.slane %v2954_v7, 2  ;;  %v872_v18 = vrot.slane %v2957_v8, 2  ;;  %v2988_v27 = vld [vmem:[%s2951_s1 + $0x20] sm:$0xff]  ;;  %v2998_v36 = vld [vmem:[%s2951_s1 + $0x28] sm:$0xff]  ;;  %s3507_s0 = smov %s3506_s26 }
  0x3f   : > { %v2975_v19 = vadd.s32 2, %v665_v6  ;;  %v873_v20 = vrot.slane %v2960_v9, 2  ;;  %v816_v23 = vpack.c.bf16 %v2960_v9, %v2960_v9  ;;  %v817_v24 = vpack.c.bf16 %v2969_v14, %v2969_v14  ;;  %v3017_v47 = vld [vmem:[%s2951_s1 + $0x30] sm:$0xff]  ;;  %v3020_v48 = vld [vmem:[%s2951_s1 + $0x38] sm:$0xff] }
  0x40   : > { %v948_v21 = vunpack.c.l.b16 %v814_v12  ;;  %v949_v22 = vunpack.c.l.b16 %v815_v13  ;;  %v886_v26 = vsel %vm879_vm0, %v871_v17, %v872_v18  ;;  %v874_v31 = vrot.slane %v2969_v14, 2 }
  0x41   : > { %vm799_vm1 = vcmp.lt.s32.totalorder %v2975_v19, 16  ;;  %v885_v25 = vsel %vm879_vm0, %v872_v18, %v873_v20  ;;  %v912_v30 = vpack.c.bf16 %v886_v26, %v886_v26  ;;  %v950_v33 = vunpack.c.l.b16 %v816_v23  ;;  %s3512_s20 = smov %s3511_s27  ;;  %s2072_s13 = scalar_lea.hbm %s3511_s27, %s2934_s6 }
  0x42   : > { %v2990_v28 = vpack.c.b16 %v949_v22, %v948_v21  ;;  %v905_v29 = vsel %vm799_vm1, %v885_v25, 0.0  ;;  %v951_v34 = vunpack.c.l.b16 %v817_v24  ;;  %v2995_v35 = vadd.s32 2, %v679_v10  ;;  %s3416_s25 = sshll.u32 %s2072_s13, 4  ;;  %s2673_s23 = scalar_lea.hbm %s3512_s20, 8  ;;  %s2076_s25 = int_to_ptr.hbm [resolvable:$true] %s3416_s25 }
  0x43   : > { %v913_v32 = vpack.c.bf16 %v905_v29, %v905_v29  ;;  %v976_v37 = vunpack.c.l.b16 %v912_v30  ;;  %v875_v38 = vrot.slane %v2988_v27, 2  ;;  %v884_v39 = vsel %vm879_vm0, %v873_v20, %v874_v31  ;;  %s2667_s19 = sshra.s32 %s2076_s25, 4  ;;  %s2668_s19 = int_to_ptr.hbm [resolvable:$true] %s2667_s19 }
  0x44   : > { %960 = vrot.lane.b32.xlu0 %v2990_v28, %s2738_s21  ;;  %v818_v40 = vpack.c.bf16 %v2988_v27, %v2988_v27  ;;  %v3008_v42 = vpack.c.b16 %v951_v34, %v950_v33  ;;  %vm801_vm3 = vcmp.lt.s32.totalorder %v2995_v35, 16  ;;  %v914_v43 = vpack.c.bf16 %v884_v39, %v884_v39  ;;  %v2208_v39 = vld [vmem:[%s3506_s26] sm:$0xf]  ;;  %s3510_s26 = sld [smem:[#allocation17_spill]]  ;;  %s2669_s1 = scalar_lea.hbm %s2668_s19, 4 }
  0x45   : > { %v977_v41 = vunpack.c.l.b16 %v913_v32  ;;  %v822_v44 = vrot.slane %v2954_v7, 6  ;;  %v883_v45 = vsel %vm879_vm0, %v874_v31, %v875_v38  ;;  %v819_v46 = vpack.c.bf16 %v2998_v36, %v2998_v36  ;;  %p2670_p0 = scmp.ne.s32.totalorder %s2668_s19, %s2669_s1  ;;  %p2674_p3 = scmp.lt.s32.totalorder %s2668_s19, %s3512_s20 }
  0x46   : > { %962 = vrot.lane.b32.xlu1 %v3008_v42, %s2738_s21  ;;  %v907_v51 = vsel %vm801_vm3, %v883_v45, 0.0  ;;  %v978_v52 = vunpack.c.l.b16 %v914_v43  ;;  %v952_v53 = vunpack.c.l.b16 %v818_v40  ;;  %v820_v56 = vpack.c.bf16 %v3017_v47, %v3017_v47  ;;  %v2353_v40 = vld [vmem:[%s3507_s0] sm:$0x30]  ;;  %p2675_p4 = scmp.lt.s32.totalorder %s2673_s23, %s2669_s1 }
  0x47   : > { %v984_v50 = vpack.c.b16 %v977_v41, %v976_v37  ;;  %v915_v54 = vpack.c.bf16 %v907_v51, %v907_v51  ;;  %v953_v55 = vunpack.c.l.b16 %v819_v46  ;;  %v821_v57 = vpack.c.bf16 %v3020_v48, %v3020_v48  ;;  %p2671_p1 = pnand %p2670_p0, %p2871_p5 }
  0x48   : > { %v823_v58 = vrot.slane %v2957_v8, 6  ;;  %v876_v59 = vrot.slane %v2998_v36, 2  ;;  %v877_v60 = vrot.slane %v3017_v47, 2  ;;  %v878_v61 = vrot.slane %v3020_v48, 2  ;;  %p2676_p7 = por %p2675_p4, %p2674_p3 }
  0x49   : > { %v979_v62 = vunpack.c.l.b16 %v915_v54  ;;  %v3036_v63 = vpack.c.b16 %v953_v55, %v952_v53  ;;  %v829_v0 = vrot.slane %v3020_v48, 6  ;;  %v954_v2 = vunpack.c.l.b16 %v820_v56  ;;  %p2672_p2 = pneg %p2671_p1 }
  0x4a   : > { %v3039_v3 = vadd.s32 2, %v707_v15  ;;  %v880_v4 = vsel %vm879_vm0, %v877_v60, %v878_v61  ;;  %v887_v5 = vsel %vm879_vm0, %v878_v61, %v871_v17  ;;  %v3045_v6 = vadd.s32 2, %v693_v16  ;;  %s625_s29 = sand.u32 1, %s3510_s26  }
  0x4b   : > { %v985_v7 = vpack.c.b16 %v979_v62, %v978_v52  ;;  %964 = vrot.lane.b32.xlu2 %v3036_v63, %s2738_s21  ;;  %v955_v8 = vunpack.c.l.b16 %v821_v57  ;;  %v918_v10 = vpack.c.bf16 %v880_v4, %v880_v4  ;;  %vm758_vm4 = vcmp.ge.s32.totalorder %v3022_v49, 0  ;;  %s2202_s18 = sshll.u32 %s625_s29, 2  ;;  %s2062_s6 = scalar_lea.sflag [#allocation4], %s625_s29 }
  0x4c   : > { %988 = vrot.lane.b32.xlu0 %v984_v50, %s2739_s22  ;;  %vm805_vm5 = vcmp.lt.s32.totalorder %v3039_v3, 16  ;;  %vm803_vm6 = vcmp.lt.s32.totalorder %v3045_v6, 16  ;;  %v881_v11 = vsel %vm879_vm0, %v876_v59, %v877_v60  ;;  %v882_v12 = vsel %vm879_vm0, %v875_v38, %v876_v59  ;;  %s627_s16 = scalar_lea.vmem [#allocation11], %s2202_s18  ;;  %p2677_p8 = pnand %p2676_p7, %p2672_p2 }
  0x4d   : > { %v911_v13 = vsel %vm805_vm5, %v887_v5, 0.0  ;;  %v982_v15 = vunpack.c.l.b16 %v918_v10  ;;  %v909_v16 = vsel %vm803_vm6, %v881_v11, 0.0  ;;  %v916_v17 = vpack.c.bf16 %v882_v12, %v882_v12  ;;  %s2073_s17 = sshll.u32 %s627_s16, 4  ;;  %s2074_s17 = int_to_ptr.vmem [resolvable:$true] %s2073_s17 }
  0x4e   : > { %990 = vrot.lane.b32.xlu1 %v985_v7, %s2739_s22  ;;  %v919_v18 = vpack.c.bf16 %v911_v13, %v911_v13  ;;  %v917_v20 = vpack.c.bf16 %v909_v16, %v909_v16  ;;  %v837_v21 = vsel %vm830_vm2, %v822_v44, %v823_v58  ;;  %v838_v22 = vsel %vm830_vm2, %v829_v0, %v822_v44 }
  0x4f   : > { %v3068_v23 = vpack.c.b16 %v955_v8, %v954_v2  ;;  %v980_v24 = vunpack.c.l.b16 %v916_v17  ;;  %v855_v25 = vsel %vm758_vm4, %v838_v22, 0.0  ;;  %v864_v26 = vpack.c.bf16 %v837_v21, %v837_v21 }
  0x50   : > { %v983_v29 = vunpack.c.l.b16 %v919_v18  ;;  %v981_v30 = vunpack.c.l.b16 %v917_v20  ;;  %v863_v31 = vpack.c.bf16 %v855_v25, %v855_v25  ;;  %v2209_v41 = vor.u32 %v2353_v40, %v2208_v39 }
  0x51   : > { %v929_v32 = vunpack.c.l.b16 %v864_v26  ;;  %v648_v43 = vadd.s32 16, %v2937_v1  ;;  %v825_v45 = vrot.slane %v2969_v14, 6  ;;  %v824_v51 = vrot.slane %v2960_v9, 6 }
  0x52   : > { %v987_v33 = vpack.c.b16 %v983_v29, %v982_v15  ;;  %v986_v34 = vpack.c.b16 %v981_v30, %v980_v24  ;;  %v928_v37 = vunpack.c.l.b16 %v863_v31  ;;  %v1040_v44 = vsel %vm1038_vm7, %v2209_v41, 0 }
  0x53   : > { %1049 = vmatpush.bf16.msra.mxu0 %v1040_v44  ;;  %v672_v46 = vand.u32 15, %v648_v43  ;;  %v827_v52 = vrot.slane %v2998_v36, 6  ;;  %v835_v53 = vsel %vm830_vm2, %v824_v51, %v825_v45  ;;  %v836_v54 = vsel %vm830_vm2, %v823_v58, %v824_v51  ;;  %v1174_v51 = vld [vmem:[%s3457_s5 + $0x70] sm:$0xff] }
  0x54   : > { %966 = vrot.lane.b32.xlu0 %v3068_v23, %s2738_s21  ;;  %992 = vrot.lane.b32.xlu2 %v986_v34, %s2739_s22  ;;  %v936_v38 = vpack.c.b16 %v929_v32, %v928_v37  ;;  %v866_v55 = vpack.c.bf16 %v835_v53, %v835_v53  ;;  %v650_v57 = vadd.s32 32, %v2937_v1  ;;  %v826_v59 = vrot.slane %v2988_v27, 6  ;;  %v1173_v53 = vld [vmem:[%s3457_s5 + $0x68] sm:$0xff] }
  0x55   : > { %v3084_v50 = vadd.s32 4294967294, %v672_v46  ;;  %v828_v12 = vrot.slane %v3017_v47, 6  ;;  %v652_v17 = vadd.s32 48, %v2937_v1  ;;  %v1175_v46 = vld [vmem:[%s3457_s5 + $0x78] sm:$0xff]  ;;  %vm1180_vm7 = vcmask 1041409   ;;  %v1886_v1 = vld [vmem:[#allocation8 + $0x70] sm:$0xff] }
  0x56   : > { %994 = vrot.lane.b32.xlu1 %v987_v33, %s2739_s22  ;;  %v931_v9 = vunpack.c.l.b16 %v866_v55  ;;  %v686_v36 = vand.u32 15, %v650_v57  ;;  %v833_v61 = vsel %vm830_vm2, %v826_v59, %v827_v52  ;;  %v834_v58 = vsel %vm830_vm2, %v825_v45, %v826_v59  ;;  %1187 = vmatpush.msra.mxu2 %v1175_v46  ;;  %v1171_v55 = vld [vmem:[%s3457_s5 + $0x58] sm:$0xff]  ;;  %v1169_v57 = vld [vmem:[%s3457_s5 + $0x48] sm:$0xff]  ;;  %v1168_v59 = vld [vmem:[%s3457_s5 + $0x40] sm:$0xff] }
  0x57   : > { %vm760_vm8 = vcmp.ge.s32.totalorder %v3084_v50, 0  ;;  %v868_v4 = vpack.c.bf16 %v833_v61, %v833_v61  ;;  %v831_v18 = vsel %vm830_vm2, %v828_v12, %v829_v0  ;;  %v832_v20 = vsel %vm830_vm2, %v827_v52, %v828_v12  ;;  %v1165_v61 = vld [vmem:[%s3457_s5 + $0x28] sm:$0xff]  ;;  %v1160_v12 = vld [vmem:[%s3457_s5] sm:$0xff] }
  0x58   : > { %v857_v14 = vsel %vm760_vm8, %v836_v54, 0.0  ;;  %v3099_v2 = vadd.s32 4294967294, %v686_v36  ;;  %v700_v21 = vand.u32 15, %v652_v17  ;;  %v870_v24 = vpack.c.bf16 %v831_v18, %v831_v18  ;;  %1188 = vmatpush.msra.mxu2 %v1174_v51  ;;  %v1172_v54 = vld [vmem:[%s3457_s5 + $0x60] sm:$0xff] }
  0x59   : > { %v865_v56 = vpack.c.bf16 %v857_v14, %v857_v14  ;;  %v933_v7 = vunpack.c.l.b16 %v868_v4  ;;  %v1170_v14 = vld [vmem:[%s3457_s5 + $0x50] sm:$0xff]  ;;  %v2485_v4 = vld [vmem:[%s3454_s2] ss:$0 sm:$0xff] }
  0x5a   : > { %vm762_vm9 = vcmp.ge.s32.totalorder %v3099_v2, 0  ;;  %v3117_v22 = vadd.s32 4294967294, %v700_v21  ;;  %v935_v29 = vunpack.c.l.b16 %v870_v24  ;;  %1189 = vmatpush.msra.mxu2 %v1173_v53  ;;  %v1223_v21 = vld [vmem:[#allocation2 + $0x78] sm:$0xff]  ;;  %v1222_v24 = vld [vmem:[#allocation2 + $0x70] sm:$0xff]  ;;  %v1216_v53 = vld [vmem:[#allocation2 + $0x40] sm:$0xff] }
  0x5b   : > { %v930_v60 = vunpack.c.l.b16 %v865_v56  ;;  %v859_v5 = vsel %vm762_vm9, %v834_v58, 0.0  ;;  %v1163_v58 = vld [vmem:[%s3457_s5 + $0x18] sm:$0xff]  ;;  %1224 = vmatpush.msra.mxu3 %v1223_v21 }
  0x5c   : > { %v867_v27 = vpack.c.bf16 %v859_v5, %v859_v5  ;;  %vm764_vm13 = vcmp.ge.s32.totalorder %v3117_v22, 0  ;;  %1190 = vmatpush.msra.mxu2 %v1172_v54 }
  0x5d   : > { %v937_v62 = vpack.c.b16 %v931_v9, %v930_v60  ;;  %v861_v25 = vsel %vm764_vm13, %v832_v20, 0.0  ;;  %v1167_v9 = vld [vmem:[%s3457_s5 + $0x38] sm:$0xff]  ;;  %v1166_v60 = vld [vmem:[%s3457_s5 + $0x30] sm:$0xff]  ;;  %1225 = vmatpush.msra.mxu3 %v1222_v24 }
  0x5e   : > { %v932_v8 = vunpack.c.l.b16 %v867_v27  ;;  %v869_v26 = vpack.c.bf16 %v861_v25, %v861_v25  ;;  %1191 = vmatpush.msra.mxu2 %v1171_v55  ;;  %v1161_v27 = vld [vmem:[%s3457_s5 + $0x8] sm:$0xff] }
  0x60   : > { %v938_v10 = vpack.c.b16 %v933_v7, %v932_v8  ;;  %v934_v30 = vunpack.c.l.b16 %v869_v26  ;;  %1192 = vmatpush.msra.mxu2 %v1170_v14  ;;  %v1162_v7 = vld [vmem:[%s3457_s5 + $0x10] sm:$0xff]  ;;  %v1071_v26 = vld [vmem:[%s3455_s3] sm:$0x3] }
  0x62   : > { %v939_v0 = vpack.c.b16 %v935_v29, %v934_v30  ;;  %1193 = vmatpush.msra.mxu2 %v1169_v57  ;;  %v1221_v30 = vld [vmem:[#allocation2 + $0x68] sm:$0xff] }
  0x63   : > { %1226 = vmatpush.msra.mxu3 %v1221_v30 }
  0x64   : > { %1194 = vmatpush.msra.mxu2 %v1168_v59 }
  0x66   : > { %1195 = vmatpush.msra.mxu2 %v1167_v9 }
  0x68   : > { %1196 = vmatpush.msra.mxu2 %v1166_v60  ;;  %v1214_v60 = vld [vmem:[#allocation2 + $0x30] sm:$0xff] }
  0x6a   : > { %1197 = vmatpush.msra.mxu2 %v1165_v61 }
  0xa5   : > { %v965_v33 = vpop.permute.xlu2 %964 }
  0xa6   : > { %v1005_v34 = vsel %vm996_vm10, %v938_v10, %v965_v33 }
  0xae   : > { %v993_v37 = vpop.permute.xlu2 %992 }
  0xb6   : > { %v961_v11 = vpop.permute.xlu0 %960 }
  0xb7   : > { %v999_v13 = vsel %vm996_vm10, %v936_v38, %v961_v11  ;;  %v1015_v38 = vsel %vm1009_vm11, %v1005_v34, %v993_v37 }
  0xb8   : > { %v963_v47 = vpop.permute.xlu1 %962 }
  0xb9   : > { %v1002_v48 = vsel %vm996_vm10, %v937_v62, %v963_v47  ;;  %v1164_v62 = vld [vmem:[%s3457_s5 + $0x20] sm:$0xff]  ;;  %v2740_v47 = vmov 16.0  }
  0xba   : > { %1198 = vmatpush.msra.mxu2 %v1164_v62  ;;  %2493 = vrcp.f32 %v2740_v47 }
  0xbc   : > { %1199 = vmatpush.msra.mxu2 %v1163_v58  ;;  %v1213_v58 = vld [vmem:[#allocation2 + $0x28] sm:$0xff] }
  0xbe   : > { %v989_v15 = vpop.permute.xlu0 %988  ;;  %1200 = vmatpush.msra.mxu2 %v1162_v7 }
  0xbf   : > { %v1011_v16 = vsel %vm1009_vm11, %v999_v13, %v989_v15 }
  0xc0   : > { %2210 = vmatmul.msk.bf16.vlgmr.msra.gmra.mxu0 %vm1029_vm12, %v1011_v16  ;;  %v991_v31 = vpop.permute.xlu1 %990  ;;  %1201 = vmatpush.msra.mxu2 %v1161_v27  ;;  %v2494_v33 = vpop.eup %2493 }
  0xc1   : > { %v1013_v32 = vsel %vm1009_vm11, %v1002_v48, %v991_v31  ;;  %v1090_v48 = vsel %vm1088_vm14, %v1071_v26, 0  ;;  %vm1154_vm15 = vweird.f32 %v2494_v33 }
  0xc2   : > { %1202 = vmatpush.msra.mxu2 %v1160_v12  ;;  %1099 = vmatpush.bf16.msra.mxu1 %v1090_v48 }
  0xc5   : > { %2214 = vmatmul.msk.bf16.vlgmr.msra.gmra.mxu1 %vm996_vm10, %v2990_v28 }
  0xc6   : > { %v967_v39 = vpop.permute.xlu0 %966 }
  0xc7   : > { %v1008_v40 = vsel %vm996_vm10, %v939_v0, %v967_v39 }
  0xc8   : > { %v995_v41 = vpop.permute.xlu1 %994 }
  0xc9   : > { %v1017_v43 = vsel %vm1009_vm11, %v1008_v40, %v995_v41  ;;  %v1150_v40 = vmul.f32 16.0, %v2494_v33  ;;  %v1218_v41 = vld [vmem:[#allocation2 + $0x50] sm:$0xff]  ;;  %vm1182_vm11 = vcmask 1042434  }
  0xd0   : > { %2211 = vmatmul.msk.bf16.gmra.mxu0 %vm1029_vm12, %v1013_v32  ;;  %v1220_v32 = vld [vmem:[#allocation2 + $0x60] sm:$0xff] }
  0xd1   : > { %1227 = vmatpush.msra.mxu3 %v1220_v32 }
  0xd5   : > { %2215 = vmatmul.msk.bf16.gmra.mxu1 %vm996_vm10, %v3008_v42 }
  0xe0   : > { %2212 = vmatmul.msk.bf16.gmra.mxu0 %vm1029_vm12, %v1015_v38  ;;  %v1219_v38 = vld [vmem:[#allocation2 + $0x58] sm:$0xff] }
  0xe1   : > { %1228 = vmatpush.msra.mxu3 %v1219_v38  ;;  %v2377_v38 = vld [vmem:[#allocation5 + $0xb8] sm:$0xff] }
  0xe2   : > { %1714 = vmatpush.bf16.msrb.mxu0 %v2377_v38 }
  0xe3   : > { %1229 = vmatpush.msra.mxu3 %v1218_v41 }
  0xe5   : > { %2216 = vmatmul.msk.bf16.gmra.mxu1 %vm996_vm10, %v3036_v63 }
  0xf0   : > { %2213 = vmatmul.msk.bf16.gmra.mxu0 %vm1029_vm12, %v1017_v43  ;;  %vm3482_vm12 = vcmask 1043459  }
  0xf5   : > { %2217 = vmatmul.msk.bf16.gmra.mxu1 %vm996_vm10, %v3068_v23  ;;  %v2368_v23 = vld [vmem:[#allocation5 + $0x70] sm:$0xff] }
 0x13d   : > { %v1051_v44 = vpop.f32.mrf.mxu0 }
 0x13e   : > { %v3188_v13 = vadd.f32 %v2485_v4, %v1051_v44 }
 0x142   : > { %v3226_v41 = vpop.f32.mrf.mxu1 }
 0x145   : > { %v1053_v45 = vpop.f32.mrf.mxu0 }
 0x146   : > { %v3181_v8 = vadd.f32 %v2485_v4, %v1053_v45  ;;  %v1217_v45 = vld [vmem:[#allocation2 + $0x48] sm:$0xff] }
 0x147   : > { %1230 = vmatpush.msra.mxu3 %v1217_v45  ;;  %v2385_v45 = vld [vmem:[#allocation7 + $0x38] sm:$0xff] }
 0x148   : > { %v1121_v18 = vadd.f32 %v3181_v8, %v3188_v13  ;;  %1811 = vmatpush.bf16.msrb.mxu1 %v2385_v45 }
 0x149   : > { %1231 = vmatpush.msra.mxu3 %v1216_v53  ;;  %v2383_v53 = vld [vmem:[#allocation7 + $0x28] sm:$0xff] }
 0x14a   : > { %v1122_v31 = vrot.slane %v1121_v18, 4 }
 0x14c   : > { %v1123_v39 = vadd.f32 %v1122_v31, %v1121_v18 }
 0x14d   : > { %v1056_v52 = vpop.f32.mrf.mxu0 }
 0x14e   : > { %v3183_v10 = vadd.f32 %v2485_v4, %v1056_v52  ;;  %v1124_v46 = vrot.slane %v1123_v39, 2  ;;  %v1151_v52 = vsub.f32 1.0, %v1150_v40 }
 0x150   : > { %v1125_v57 = vadd.f32 %v1124_v46, %v1123_v39  ;;  %v1152_v9 = vmul.f32 %v2494_v33, %v1151_v52  ;;  %v2384_v46 = vld [vmem:[#allocation7 + $0x30] sm:$0xff]  ;;  %v2367_v52 = vld [vmem:[#allocation5 + $0x68] sm:$0xff] }
 0x151   : > { %1812 = vmatpush.bf16.msrb.mxu1 %v2384_v46 }
 0x152   : > { %v1126_v7 = vrot.slane %v1125_v57, 1 }
 0x154   : > { %v1127_v47 = vadd.f32 %v1126_v7, %v1125_v57  ;;  %v2382_v57 = vld [vmem:[#allocation7 + $0x20] sm:$0xff] }
 0x155   : > { %v1058_v56 = vpop.f32.mrf.mxu0  ;;  %1813 = vmatpush.bf16.msrb.mxu1 %v2383_v53  ;;  %v2374_v7 = vld [vmem:[#allocation5 + $0xa0] sm:$0xff] }
 0x156   : > { %v3173_v5 = vadd.f32 %v2485_v4, %v1058_v56  ;;  %v1215_v56 = vld [vmem:[#allocation2 + $0x38] sm:$0xff] }
 0x157   : > { %1232 = vmatpush.msra.mxu3 %v1215_v56  ;;  %v2366_v56 = vld [vmem:[#allocation5 + $0x60] sm:$0xff] }
 0x158   : > { %v1128_v15 = vadd.f32 %v3173_v5, %v3183_v10 }
 0x159   : > { %1233 = vmatpush.msra.mxu3 %v1214_v60  ;;  %1814 = vmatpush.bf16.msrb.mxu1 %v2382_v57  ;;  %v2359_v60 = vld [vmem:[#allocation5 + $0x28] sm:$0xff] }
 0x15a   : > { %v1129_v25 = vrot.slane %v1128_v15, 4 }
 0x15b   : > { %1234 = vmatpush.msra.mxu3 %v1213_v58 }
 0x15c   : > { %v1130_v34 = vadd.f32 %v1129_v25, %v1128_v15  ;;  %v1210_v25 = vld [vmem:[#allocation2 + $0x10] sm:$0xff] }
 0x15d   : > { %v1061_v36 = vpop.f32.mrf.mxu0 }
 0x15e   : > { %v3192_v16 = vadd.f32 %v2485_v4, %v1061_v36  ;;  %v1131_v43 = vrot.slane %v1130_v34, 2 }
 0x160   : > { %v1132_v54 = vadd.f32 %v1131_v43, %v1130_v34  ;;  %v1209_v34 = vld [vmem:[#allocation2 + $0x8] sm:$0xff]  ;;  %v3228_v43 = vpop.f32.mrf.mxu1 }
 0x162   : > { %v1133_v36 = vrot.slane %v1132_v54, 1 }
 0x164   : > { %v1134_v12 = vadd.f32 %v1133_v36, %v1132_v54  ;;  %v2376_v54 = vld [vmem:[#allocation5 + $0xb0] sm:$0xff]  ;;  %v2365_v36 = vld [vmem:[#allocation5 + $0x58] sm:$0xff] }
 0x165   : > { %v1063_v11 = vpop.f32.mrf.mxu0  ;;  %1715 = vmatpush.bf16.msrb.mxu0 %v2376_v54 }
 0x166   : > { %v3194_v17 = vadd.f32 %v2485_v4, %v1063_v11  ;;  %v1212_v11 = vld [vmem:[#allocation2 + $0x20] sm:$0xff] }
 0x167   : > { %1235 = vmatpush.msra.mxu3 %v1212_v11  ;;  %v2380_v11 = vld [vmem:[#allocation7 + $0x10] sm:$0xff] }
 0x168   : > { %v1135_v20 = vadd.f32 %v3194_v17, %v3192_v16  ;;  %v3230_v63 = vpop.f32.mrf.mxu1 }
 0x16a   : > { %v1136_v29 = vrot.slane %v1135_v20, 4 }
 0x16c   : > { %v1137_v37 = vadd.f32 %v1136_v29, %v1135_v20  ;;  %v1211_v20 = vld [vmem:[#allocation2 + $0x18] sm:$0xff] }
 0x16d   : > { %v1066_v0 = vpop.f32.mrf.mxu0  ;;  %1236 = vmatpush.msra.mxu3 %v1211_v20  ;;  %v2363_v20 = vld [vmem:[#allocation5 + $0x48] sm:$0xff] }
 0x16e   : > { %v1138_v44 = vrot.slane %v1137_v37, 2  ;;  %v3205_v55 = vadd.f32 %v2485_v4, %v1066_v0 }
 0x16f   : > { %1237 = vmatpush.msra.mxu3 %v1210_v25  ;;  %v2372_v25 = vld [vmem:[#allocation5 + $0x90] sm:$0xff] }
 0x170   : > { %v1139_v28 = vadd.f32 %v1138_v44, %v1137_v37  ;;  %v1208_v37 = vld [vmem:[#allocation2] sm:$0xff]  ;;  %v2369_v44 = vld [vmem:[#allocation5 + $0x78] sm:$0xff] }
 0x171   : > { %1238 = vmatpush.msra.mxu3 %v1209_v34 }
 0x172   : > { %v1140_v62 = vrot.slane %v1139_v28, 1 }
 0x173   : > { %1239 = vmatpush.msra.mxu3 %v1208_v37 }
 0x174   : > { %v1141_v18 = vadd.f32 %v1140_v62, %v1139_v28  ;;  %v2360_v28 = vld [vmem:[#allocation5 + $0x30] sm:$0xff] }
 0x175   : > { %v1068_v51 = vpop.f32.mrf.mxu0  ;;  %1685 = vmatpush.bf16.msrb.mxu3 %v2369_v44 }
 0x176   : > { %v3207_v14 = vadd.f32 %v2485_v4, %v1068_v51  ;;  %v1153_v4 = vadd.f32 %v2494_v33, %v1152_v9  ;;  %v2361_v51 = vld [vmem:[#allocation5 + $0x38] sm:$0xff]  ;;  %v2375_v9 = vld [vmem:[#allocation5 + $0xa8] sm:$0xff] }
 0x177   : > { %1656 = vmatpush.bf16.msrb.mxu2 %v2361_v51  ;;  %1716 = vmatpush.bf16.msrb.mxu0 %v2375_v9 }
 0x178   : > { %v1142_v59 = vadd.f32 %v3207_v14, %v3205_v55  ;;  %v3213_v24 = vsel %vm1154_vm15, %v2494_v33, %v1153_v4  ;;  %v2364_v4 = vld [vmem:[#allocation5 + $0x50] sm:$0xff] }
 0x179   : > { %v1157_v29 = vmul.f32 %v3213_v24, %v1134_v12  ;;  %v1158_v30 = vmul.f32 %v3213_v24, %v1141_v18  ;;  %v1156_v31 = vmul.f32 %v3213_v24, %v1127_v47  ;;  %1686 = vmatpush.bf16.msrb.mxu3 %v2368_v23  ;;  %v2373_v12 = vld [vmem:[#allocation5 + $0x98] sm:$0xff]  ;;  %v2379_v47 = vld [vmem:[#allocation7 + $0x8] sm:$0xff]  ;;  %v2487_v23 = vld [vmem:[%s3459_s7] ss:$0 sm:$0xff] }
 0x17a   : > { %v1143_v61 = vrot.slane %v1142_v59, 4 }
 0x17b   : > { %v1181_v0 = vsel %vm1180_vm7, %v1157_v29, %v1156_v31  ;;  %1657 = vmatpush.bf16.msrb.mxu2 %v2360_v28  ;;  %1717 = vmatpush.bf16.msrb.mxu0 %v2374_v7  ;;  %v2355_v31 = vld [vmem:[#allocation5 + $0x8] sm:$0xff] }
 0x17c   : > { %v1144_v27 = vadd.f32 %v1143_v61, %v1142_v59  ;;  %v1183_v32 = vsel %vm1182_vm11, %v1158_v30, %v1181_v0  ;;  %v3232_v59 = vpop.f32.mrf.mxu1  ;;  %v2381_v61 = vld [vmem:[#allocation7 + $0x18] sm:$0xff]  ;;  %v2362_v30 = vld [vmem:[#allocation5 + $0x40] sm:$0xff] }
 0x17d   : > { %1687 = vmatpush.bf16.msrb.mxu3 %v2367_v52  ;;  %1815 = vmatpush.bf16.msrb.mxu1 %v2381_v61 }
 0x17e   : > { %v1145_v15 = vrot.slane %v1144_v27, 2 }
 0x17f   : > { %1658 = vmatpush.bf16.msrb.mxu2 %v2359_v60  ;;  %1718 = vmatpush.bf16.msrb.mxu0 %v2373_v12  ;;  %v3246_v60 = vld [vmem:[%s3460_s8] ss:$0 sm:$0xff] }
 0x180   : > { %v1146_v21 = vadd.f32 %v1145_v15, %v1144_v27  ;;  %v2358_v27 = vld [vmem:[#allocation5 + $0x20] sm:$0xff]  ;;  %v2357_v15 = vld [vmem:[#allocation5 + $0x18] sm:$0xff] }
 0x181   : > { %1688 = vmatpush.bf16.msrb.mxu3 %v2366_v56  ;;  %1816 = vmatpush.bf16.msrb.mxu1 %v2380_v11 }
 0x182   : > { %v1147_v26 = vrot.slane %v1146_v21, 1 }
 0x183   : > { %1659 = vmatpush.bf16.msrb.mxu2 %v2358_v27  ;;  %1719 = vmatpush.bf16.msrb.mxu0 %v2372_v25 }
 0x184   : > { %v1148_v48 = vadd.f32 %v1147_v26, %v1146_v21  ;;  %v3234_v18 = vpop.f32.mrf.mxu1  ;;  %v2356_v26 = vld [vmem:[#allocation5 + $0x10] sm:$0xff] }
 0x185   : > { %1689 = vmatpush.bf16.msrb.mxu3 %v2365_v36  ;;  %1817 = vmatpush.bf16.msrb.mxu1 %v2379_v47  ;;  %v3251_v36 = vld [vmem:[%s3456_s4] ss:$0 sm:$0xff] }
 0x186   : > { %v1159_v42 = vmul.f32 %v3213_v24, %v1148_v48  ;;  %v2378_v48 = vld [vmem:[#allocation7] sm:$0xff]  ;;  %v1102_v25 = vadd.f32 %v3251_v36, %v3226_v41 }
 0x187   : > { %1660 = vmatpush.bf16.msrb.mxu2 %v2357_v15 }
 0x188   : > { %v1185_v33 = vsel %vm3482_vm12, %v1159_v42, %v1183_v32  ;;  %v2371_v42 = vld [vmem:[#allocation5 + $0x88] sm:$0xff]  ;;  %v2354_v32 = vld [vmem:[#allocation5] sm:$0xff] }
 0x189   : > { %1203 = vmatmul.f32.vlgmr.msra.gmra.mxu2 %v1185_v33  ;;  %1690 = vmatpush.bf16.msrb.mxu3 %v2364_v4  ;;  %v2370_v33 = vld [vmem:[#allocation5 + $0x80] sm:$0xff] }
 0x18a   : > { %1818 = vmatpush.bf16.msrb.mxu1 %v2378_v48  ;;  %1720 = vmatpush.bf16.msrb.mxu0 %v2371_v42 }
 0x18b   : > { %1661 = vmatpush.bf16.msrb.mxu2 %v2356_v26 }
 0x18c   : > { %v3236_v0 = vpop.f32.mrf.mxu1 }
 0x18d   : > { %1691 = vmatpush.bf16.msrb.mxu3 %v2363_v20 }
 0x18e   : > { %1721 = vmatpush.bf16.msrb.mxu0 %v2370_v33 }
 0x18f   : > { %1662 = vmatpush.bf16.msrb.mxu2 %v2355_v31 }
 0x191   : > { %1692 = vmatpush.bf16.msrb.mxu3 %v2362_v30 }
 0x193   : > { %1663 = vmatpush.bf16.msrb.mxu2 %v2354_v32 }
 0x194   : > { %v3241_v51 = vpop.f32.mrf.mxu1 }
 0x195   : > { %v1117_v50 = vadd.f32 %v3251_v36, %v3241_v51 }
 0x19c   : > { %v1118_v12 = vpop.f32.mrf.mxu1 }
 0x20c   : > { %v1204_v39 = vpop.f32.mrf.mxu2 }
 0x20d   : > { %v1207_v40 = vmax.f32 %v1204_v39, 0.0 }
 0x20f   : > { %1240 = vmatmul.f32.vlgmr.msra.gmra.mxu3 %v1207_v40 }
 0x292   : > { %v1241_v62 = vpop.f32.mrf.mxu3 }
 0x293   : > { %v2218_v58 = vmul.f32 -1.442695, %v1241_v62 }
 0x295   : > { %2495 = vpow2.f32 %v2218_v58 }
 0x29b   : > { %v2496_v21 = vpop.eup %2495 }
 0x29c   : > { %v1247_v29 = vadd.f32 1.0, %v2496_v21 }
 0x29e   : > { %2497 = vrcp.f32 %v1247_v29  ;;  %v1259_v39 = vand.u32 2147483648, %v1247_v29  ;;  %v1257_v44 = vand.u32 2147483647, %v1247_v29  ;;  %vm1253_vm14 = vweird.f32 %v1247_v29 }
 0x2a0   : > { %v1260_v46 = vor.u32 1.1754944e-38, %v1259_v39  ;;  %vm1258_vm12 = vcmp.eq.f32.partialorder %v1257_v44, 8.507059e+37 }
 0x2a4   : > { %v2498_v34 = vpop.eup %2497 }
 0x2a5   : > { %v1249_v37 = vmul.f32 %v2498_v34, %v1247_v29  ;;  %vm1254_vm10 = vweird.f32 %v2498_v34  ;;  %v1119_v29 = vadd.f32 %v3251_v36, %v1118_v12 }
 0x2a6   : > { %vm1255_vm15 = vmor %vm1253_vm14, %vm1254_vm10 }
 0x2a7   : > { %v1250_v38 = vsub.f32 1.0, %v1249_v37  ;;  %v1107_v37 = vadd.f32 %v3251_v36, %v3230_v63 }
 0x2a9   : > { %v1251_v40 = vmul.f32 %v2498_v34, %v1250_v38  ;;  %v1112_v38 = vadd.f32 %v3251_v36, %v3234_v18  ;;  %v1109_v18 = vadd.f32 %v3251_v36, %v3232_v59 }
 0x2ab   : > { %v1252_v45 = vadd.f32 %v2498_v34, %v1251_v40 }
 0x2ad   : > { %v1256_v52 = vsel %vm1255_vm15, %v2498_v34, %v1252_v45 }
 0x2ae   : > { %v1261_v53 = vsel %vm1258_vm12, %v1260_v46, %v1256_v52 }
 0x2af   : > { %v1267_v54 = vmul.f32 %v2487_v23, %v1261_v53 }
 0x2b1   : > { %v1270_v28 = vrot.slane %v1267_v54, 2  ;;  %v1271_v56 = vrot.slane %v1267_v54, 3  ;;  %v1272_v57 = vperm.slane %v1267_v54, 0  ;;  %v1269_v9 = vrot.slane %v1267_v54, 1 }
 0x2b3   : > { %v1274_v61 = vperm.slane %v1270_v28, 0  ;;  %v1275_v62 = vperm.slane %v1271_v56, 0  ;;  %v1280_v58 = vmul.f32 %v1272_v57, %v3188_v13  ;;  %v1281_v7 = vmul.f32 %v1272_v57, %v3181_v8 }
 0x2b4   : > { %v1273_v27 = vperm.slane %v1269_v9, 0  ;;  %v1104_v8 = vadd.f32 %v3251_v36, %v3228_v43 }
 0x2b5   : > { %v1284_v4 = vmul.f32 %v1274_v61, %v3192_v16  ;;  %v1287_v11 = vmul.f32 %v1275_v62, %v3207_v14  ;;  %v1292_v15 = vadd.f32 %v3246_v60, %v1280_v58  ;;  %v1293_v20 = vadd.f32 %v3246_v60, %v1281_v7 }
 0x2b6   : > { %v1282_v47 = vmul.f32 %v1273_v27, %v3183_v10  ;;  %v1283_v21 = vmul.f32 %v1273_v27, %v3173_v5 }
 0x2b7   : > { %v1299_v13 = vadd.f32 %v3246_v60, %v1287_v11  ;;  %v1300_v16 = vmax.f32 %v1292_v15, 0.0  ;;  %v1301_v26 = vmax.f32 %v1293_v20, 0.0  ;;  %v1296_v48 = vadd.f32 %v3246_v60, %v1284_v4 }
 0x2b8   : > { %v1294_v14 = vadd.f32 %v3246_v60, %v1282_v47  ;;  %v1295_v31 = vadd.f32 %v3246_v60, %v1283_v21 }
 0x2b9   : > { %v1307_v30 = vmax.f32 %v1299_v13, 0.0  ;;  %v3269_v10 = vadd.f32 %v1300_v16, %v1102_v25  ;;  %v1309_v5 = vadd.f32 %v1301_v26, %v1104_v8  ;;  %v1304_v39 = vmax.f32 %v1296_v48, 0.0 }
 0x2ba   : > { %v1302_v42 = vmax.f32 %v1294_v14, 0.0  ;;  %v1303_v44 = vmax.f32 %v1295_v31, 0.0  ;;  %v1285_v25 = vmul.f32 %v1274_v61, %v3194_v17  ;;  %v1286_v13 = vmul.f32 %v1275_v62, %v3205_v55 }
 0x2bb   : > { %v3272_v41 = vadd.f32 %v1307_v30, %v1119_v29  ;;  %v1316_v43 = vpack.c.bf16 %v3269_v10, %v3269_v10  ;;  %v1317_v32 = vpack.c.bf16 %v1309_v5, %v1309_v5  ;;  %v1324_v33 = vrot.slane %v3269_v10, 6 }
 0x2bc   : > { %v1325_v34 = vrot.slane %v1309_v5, 6  ;;  %v1310_v52 = vadd.f32 %v1302_v42, %v1107_v37  ;;  %v1356_v63 = vrot.slane %v3269_v10, 2  ;;  %v1357_v28 = vrot.slane %v1309_v5, 2 }
 0x2bd   : > { %v1331_v40 = vrot.slane %v3272_v41, 6  ;;  %v1420_v45 = vunpack.c.l.b16 %v1316_v43  ;;  %v1421_v23 = vunpack.c.l.b16 %v1317_v32  ;;  %v3293_v58 = vadd.f32 %v1304_v39, %v1112_v38 }
 0x2be   : > { %v1338_v46 = vsel %vm830_vm2, %v1324_v33, %v1325_v34  ;;  %v1358_v9 = vrot.slane %v1310_v52, 2  ;;  %v1370_v27 = vsel %vm879_vm0, %v1356_v63, %v1357_v28  ;;  %v1311_v59 = vadd.f32 %v1303_v44, %v1109_v18 }
 0x2bf   : > { %v1339_v53 = vsel %vm830_vm2, %v1331_v40, %v1324_v33  ;;  %v1349_v54 = vpack.c.bf16 %v1338_v46, %v1338_v46  ;;  %v1428_v56 = vpack.c.b16 %v1421_v23, %v1420_v45  ;;  %v1380_v11 = vpack.c.bf16 %v1370_v27, %v1370_v27 }
 0x2c0   : > { %v1340_v57 = vsel %vm758_vm4, %v1339_v53, 0.0  ;;  %v1369_v4 = vsel %vm879_vm0, %v1357_v28, %v1358_v9  ;;  %v1326_v20 = vrot.slane %v1310_v52, 6  ;;  %v1360_v21 = vrot.slane %v3293_v58, 2 }
 0x2c1   : > { %v1348_v7 = vpack.c.bf16 %v1340_v57, %v1340_v57  ;;  %1693 = vmatmul.bf16.vlgmr.msrb.gmra.mxu3 %v1428_v56  ;;  %1819 = vmatmul.bf16.vlgmr.msrb.gmra.mxu1 %v1428_v56  ;;  %v1397_v15 = vunpack.c.l.b16 %v1349_v54  ;;  %v1373_v49 = vsel %vm799_vm1, %v1369_v4, 0.0  ;;  %v1444_v16 = vunpack.c.l.b16 %v1380_v11 }
 0x2c2   : > { %v1381_v47 = vpack.c.bf16 %v1373_v49, %v1373_v49  ;;  %v1327_v14 = vrot.slane %v1311_v59, 6  ;;  %v1359_v29 = vrot.slane %v1311_v59, 2  ;;  %v1337_v30 = vsel %vm830_vm2, %v1325_v34, %v1326_v20 }
 0x2c3   : > { %v1396_v12 = vunpack.c.l.b16 %v1348_v7  ;;  %v1318_v19 = vpack.c.bf16 %v1310_v52, %v1310_v52  ;;  %v1319_v5 = vpack.c.bf16 %v1311_v59, %v1311_v59  ;;  %v1297_v31 = vadd.f32 %v3246_v60, %v1285_v25 }
 0x2c4   : > { %v1445_v26 = vunpack.c.l.b16 %v1381_v47  ;;  %v1298_v42 = vadd.f32 %v3246_v60, %v1286_v13  ;;  %v1336_v17 = vsel %vm830_vm2, %v1326_v20, %v1327_v14  ;;  %v1342_v55 = vsel %vm760_vm8, %v1337_v30, 0.0 }
 0x2c5   : > { %v1404_v8 = vpack.c.b16 %v1397_v15, %v1396_v12  ;;  %v1367_v61 = vsel %vm879_vm0, %v1359_v29, %v1360_v21  ;;  %v1422_v62 = vunpack.c.l.b16 %v1318_v19  ;;  %v1423_v43 = vunpack.c.l.b16 %v1319_v5 }
 0x2c6   : > { %v1452_v48 = vpack.c.b16 %v1445_v26, %v1444_v16  ;;  %v1350_v32 = vpack.c.bf16 %v1342_v55, %v1342_v55  ;;  %v1351_v33 = vpack.c.bf16 %v1336_v17, %v1336_v17  ;;  %v1368_v34 = vsel %vm879_vm0, %v1358_v9, %v1359_v29 }
 0x2c7   : > { %1664 = vmatmul.bf16.vlgmr.msrb.gmra.mxu2 %v1404_v8  ;;  %v1375_v60 = vsel %vm801_vm3, %v1367_v61, 0.0  ;;  %v1305_v37 = vmax.f32 %v1297_v31, 0.0  ;;  %v1306_v38 = vmax.f32 %v1298_v42, 0.0  ;;  %v1114_v39 = vadd.f32 %v3251_v36, %v3236_v0 }
 0x2c8   : > { %1722 = vmatmul.bf16.vlgmr.msrb.gmra.mxu0 %v1452_v48  ;;  %v1429_v44 = vpack.c.b16 %v1423_v43, %v1422_v62  ;;  %v1382_v45 = vpack.c.bf16 %v1368_v34, %v1368_v34  ;;  %v1383_v23 = vpack.c.bf16 %v1375_v60, %v1375_v60  ;;  %v1398_v46 = vunpack.c.l.b16 %v1350_v32 }
 0x2c9   : > { %v1399_v52 = vunpack.c.l.b16 %v1351_v33  ;;  %v1313_v53 = vadd.f32 %v1305_v37, %v1114_v39  ;;  %v1314_v54 = vadd.f32 %v1306_v38, %v1117_v50  ;;  %v1328_v35 = vrot.slane %v3293_v58, 6  ;;  %v1887_v50 = vld [vmem:[#allocation8 + $0x78] sm:$0xff] }
 0x2ca   : > { %v1446_v28 = vunpack.c.l.b16 %v1382_v45  ;;  %v1447_v18 = vunpack.c.l.b16 %v1383_v23  ;;  %v1320_v7 = vpack.c.bf16 %v3293_v58, %v3293_v58  ;;  %v1363_v48 = vrot.slane %v3272_v41, 2  ;;  %1896 = vmatpush.msra.mxu2 %v1887_v50 }
 0x2cb   : > { %v1405_v56 = vpack.c.b16 %v1399_v52, %v1398_v46  ;;  %v1329_v57 = vrot.slane %v1313_v53, 6  ;;  %v1361_v9 = vrot.slane %v1313_v53, 2  ;;  %v1362_v0 = vrot.slane %v1314_v54, 2 }
 0x2cc   : > { %v1335_v51 = vsel %vm830_vm2, %v1327_v14, %v1328_v35  ;;  %v1453_v36 = vpack.c.b16 %v1447_v18, %v1446_v28  ;;  %v1321_v27 = vpack.c.bf16 %v1313_v53, %v1313_v53  ;;  %v1424_v12 = vunpack.c.l.b16 %v1320_v7  ;;  %1897 = vmatpush.msra.mxu2 %v1886_v1  ;;  %v1885_v53 = vld [vmem:[#allocation8 + $0x68] sm:$0xff]  ;;  %v1883_v28 = vld [vmem:[#allocation8 + $0x58] sm:$0xff]  ;;  %v1882_v18 = vld [vmem:[#allocation8 + $0x50] sm:$0xff] }
 0x2cd   : > { %v1334_v4 = vsel %vm830_vm2, %v1328_v35, %v1329_v57  ;;  %v1344_v11 = vsel %vm762_vm9, %v1335_v51, 0.0  ;;  %v1365_v59 = vsel %vm879_vm0, %v1361_v9, %v1362_v0  ;;  %v1366_v47 = vsel %vm879_vm0, %v1360_v21, %v1361_v9  ;;  %v1881_v51 = vld [vmem:[#allocation8 + $0x48] sm:$0xff]  ;;  %v1879_v7 = vld [vmem:[#allocation8 + $0x38] sm:$0xff]  ;;  %v1929_v1 = vld [vmem:[#allocation10 + $0x60] sm:$0xff] }
 0x2ce   : > { %v1425_v15 = vunpack.c.l.b16 %v1321_v27  ;;  %v1352_v49 = vpack.c.bf16 %v1344_v11, %v1344_v11  ;;  %v1353_v20 = vpack.c.bf16 %v1334_v4, %v1334_v4  ;;  %v1377_v58 = vsel %vm803_vm6, %v1365_v59, 0.0  ;;  %1898 = vmatpush.msra.mxu2 %v1885_v53  ;;  %v1878_v4 = vld [vmem:[#allocation8 + $0x30] sm:$0xff]  ;;  %v2490_v59 = vld [vmem:[%s3462_s10] ss:$0 sm:$0xff] }
 0x2cf   : > { %v1384_v13 = vpack.c.bf16 %v1366_v47, %v1366_v47  ;;  %v1385_v8 = vpack.c.bf16 %v1377_v58, %v1377_v58  ;;  %v1330_v2 = vrot.slane %v1314_v54, 6  ;;  %v1322_v6 = vpack.c.bf16 %v1314_v54, %v1314_v54  ;;  %v1884_v54 = vld [vmem:[#allocation8 + $0x60] sm:$0xff]  ;;  %v1927_v53 = vld [vmem:[#allocation10 + $0x50] sm:$0xff] }
 0x2d0   : > { %v1430_v25 = vpack.c.b16 %v1425_v15, %v1424_v12  ;;  %v1400_v16 = vunpack.c.l.b16 %v1352_v49  ;;  %v1401_v26 = vunpack.c.l.b16 %v1353_v20  ;;  %v1323_v5 = vpack.c.bf16 %v3272_v41, %v3272_v41  ;;  %1899 = vmatpush.msra.mxu2 %v1884_v54 }
 0x2d1   : > { %1698 = vmatmul.bf16.gmra.mxu3 %v1429_v44  ;;  %1824 = vmatmul.bf16.gmra.mxu1 %v1429_v44  ;;  %v1448_v14 = vunpack.c.l.b16 %v1384_v13  ;;  %v1449_v29 = vunpack.c.l.b16 %v1385_v8  ;;  %v1333_v21 = vsel %vm830_vm2, %v1329_v57, %v1330_v2  ;;  %v1332_v31 = vsel %vm830_vm2, %v1330_v2, %v1331_v40  ;;  %v1876_v2 = vld [vmem:[#allocation8 + $0x20] sm:$0xff] }
 0x2d2   : > { %v1406_v30 = vpack.c.b16 %v1401_v26, %v1400_v16  ;;  %v1346_v42 = vsel %vm764_vm13, %v1333_v21, 0.0  ;;  %v1371_v17 = vsel %vm879_vm0, %v1363_v48, %v1356_v63  ;;  %v1426_v55 = vunpack.c.l.b16 %v1322_v6  ;;  %1900 = vmatpush.msra.mxu2 %v1883_v28  ;;  %v1877_v26 = vld [vmem:[#allocation8 + $0x28] sm:$0xff]  ;;  %v1875_v6 = vld [vmem:[#allocation8 + $0x18] sm:$0xff] }
 0x2d3   : > { %v1454_v19 = vpack.c.b16 %v1449_v29, %v1448_v14  ;;  %v1427_v61 = vunpack.c.l.b16 %v1323_v5  ;;  %v1354_v62 = vpack.c.bf16 %v1346_v42, %v1346_v42  ;;  %v1355_v43 = vpack.c.bf16 %v1332_v31, %v1332_v31 }
 0x2d4   : > { %v1364_v32 = vsel %vm879_vm0, %v1362_v0, %v1363_v48  ;;  %v1379_v41 = vsel %vm805_vm5, %v1371_v17, 0.0  ;;  %1901 = vmatpush.msra.mxu2 %v1882_v18  ;;  %v1874_v17 = vld [vmem:[#allocation8 + $0x10] sm:$0xff]  ;;  %vm3508_vm0 = vcmask 1043459  }
 0x2d5   : > { %v1431_v33 = vpack.c.b16 %v1427_v61, %v1426_v55  ;;  %v1386_v40 = vpack.c.bf16 %v1364_v32, %v1364_v32  ;;  %v1387_v34 = vpack.c.bf16 %v1379_v41, %v1379_v41  ;;  %v1402_v22 = vunpack.c.l.b16 %v1354_v62  ;;  %v1873_v32 = vld [vmem:[#allocation8 + $0x8] sm:$0xff] }
 0x2d6   : > { %v1403_v60 = vunpack.c.l.b16 %v1355_v43  ;;  %1902 = vmatpush.msra.mxu2 %v1881_v51 }
 0x2d7   : > { %1669 = vmatmul.bf16.gmra.mxu2 %v1405_v56  ;;  %v1450_v10 = vunpack.c.l.b16 %v1386_v40  ;;  %v1451_v37 = vunpack.c.l.b16 %v1387_v34  ;;  %v1872_v40 = vld [vmem:[#allocation8] sm:$0xff] }
 0x2d8   : > { %1727 = vmatmul.bf16.gmra.mxu0 %v1453_v36  ;;  %v1407_v63 = vpack.c.b16 %v1403_v60, %v1402_v22  ;;  %v1880_v36 = vld [vmem:[#allocation8 + $0x40] sm:$0xff]  ;;  %v1932_v60 = vld [vmem:[#allocation10 + $0x78] sm:$0xff] }
 0x2d9   : > { %v1455_v38 = vpack.c.b16 %v1451_v37, %v1450_v10  ;;  %1903 = vmatpush.msra.mxu2 %v1880_v36  ;;  %v1931_v10 = vld [vmem:[#allocation10 + $0x70] sm:$0xff]  ;;  %1933 = vmatpush.msra.mxu3 %v1932_v60  ;;  %v1925_v36 = vld [vmem:[#allocation10 + $0x40] sm:$0xff] }
 0x2db   : > { %1904 = vmatpush.msra.mxu2 %v1879_v7  ;;  %1934 = vmatpush.msra.mxu3 %v1931_v10 }
 0x2dd   : > { %1905 = vmatpush.msra.mxu2 %v1878_v4 }
 0x2df   : > { %1906 = vmatpush.msra.mxu2 %v1877_v26 }
 0x2e1   : > { %1703 = vmatmul.bf16.gmra.mxu3 %v1430_v25  ;;  %1829 = vmatmul.bf16.gmra.mxu1 %v1430_v25 }
 0x2e2   : > { %1907 = vmatpush.msra.mxu2 %v1876_v2 }
 0x2e4   : > { %1908 = vmatpush.msra.mxu2 %v1875_v6 }
 0x2e6   : > { %1909 = vmatpush.msra.mxu2 %v1874_v17 }
 0x2e7   : > { %1674 = vmatmul.bf16.gmra.mxu2 %v1406_v30 }
 0x2e8   : > { %1732 = vmatmul.bf16.gmra.mxu0 %v1454_v19  ;;  %1910 = vmatpush.msra.mxu2 %v1873_v32 }
 0x2ea   : > { %1911 = vmatpush.msra.mxu2 %v1872_v40 }
 0x2f1   : > { %1708 = vmatmul.bf16.gmra.mxu3 %v1431_v33  ;;  %1834 = vmatmul.bf16.gmra.mxu1 %v1431_v33 }
 0x2f7   : > { %1679 = vmatmul.bf16.gmra.mxu2 %v1407_v63 }
 0x2f8   : > { %1737 = vmatmul.bf16.gmra.mxu0 %v1455_v38 }
 0x344   : > { %v1694_v39 = vpop.f32.mrf.mxu3 }
 0x345   : > { %v1723_v44 = vpop.f32.mrf.mxu0 }
 0x34a   : > { %v1665_v3 = vpop.f32.mrf.mxu2 }
 0x34b   : > { %v1666_v47 = vadd.f32 %v2490_v59, %v1665_v3 }
 0x34c   : > { %v1696_v45 = vpop.f32.mrf.mxu3 }
 0x34d   : > { %v1725_v23 = vpop.f32.mrf.mxu0  ;;  %v1695_v30 = vadd.f32 %v1694_v39, %v1666_v47  ;;  %v1930_v39 = vld [vmem:[#allocation10 + $0x68] sm:$0xff] }
 0x34e   : > { %1935 = vmatpush.msra.mxu3 %v1930_v39 }
 0x34f   : > { %v3367_v55 = vadd.f32 %v1723_v44, %v1695_v30 }
 0x350   : > { %1936 = vmatpush.msra.mxu3 %v1929_v1 }
 0x352   : > { %v1667_v46 = vpop.f32.mrf.mxu2 }
 0x353   : > { %v1668_v49 = vadd.f32 %v2490_v59, %v1667_v46 }
 0x354   : > { %v1699_v52 = vpop.f32.mrf.mxu3 }
 0x355   : > { %v1728_v35 = vpop.f32.mrf.mxu0  ;;  %v1697_v8 = vadd.f32 %v1696_v45, %v1668_v49  ;;  %v1923_v49 = vld [vmem:[#allocation10 + $0x30] sm:$0xff] }
 0x357   : > { %v3363_v5 = vadd.f32 %v1725_v23, %v1697_v8  ;;  %v1928_v23 = vld [vmem:[#allocation10 + $0x58] sm:$0xff] }
 0x358   : > { %1937 = vmatpush.msra.mxu3 %v1928_v23 }
 0x359   : > { %v1840_v41 = vadd.f32 %v3363_v5, %v3367_v55 }
 0x35a   : > { %v1670_v56 = vpop.f32.mrf.mxu2  ;;  %1938 = vmatpush.msra.mxu3 %v1927_v53 }
 0x35b   : > { %v1671_v20 = vadd.f32 %v2490_v59, %v1670_v56  ;;  %v1841_v50 = vrot.slane %v1840_v41, 4 }
 0x35c   : > { %v1701_v57 = vpop.f32.mrf.mxu3 }
 0x35d   : > { %v1730_v9 = vpop.f32.mrf.mxu0  ;;  %v1700_v16 = vadd.f32 %v1699_v52, %v1671_v20  ;;  %v1842_v46 = vadd.f32 %v1841_v50, %v1840_v41 }
 0x35f   : > { %v3365_v31 = vadd.f32 %v1728_v35, %v1700_v16  ;;  %v1921_v16 = vld [vmem:[#allocation10 + $0x20] sm:$0xff] }
 0x362   : > { %v1672_v0 = vpop.f32.mrf.mxu2 }
 0x363   : > { %v1673_v15 = vadd.f32 %v2490_v59, %v1672_v0 }
 0x364   : > { %v1704_v27 = vpop.f32.mrf.mxu3 }
 0x365   : > { %v1733_v11 = vpop.f32.mrf.mxu0  ;;  %v1702_v58 = vadd.f32 %v1701_v57, %v1673_v15  ;;  %v1926_v57 = vld [vmem:[#allocation10 + $0x48] sm:$0xff] }
 0x366   : > { %1939 = vmatpush.msra.mxu3 %v1926_v57 }
 0x367   : > { %v3361_v48 = vadd.f32 %v1730_v9, %v1702_v58  ;;  %v1843_v9 = vrot.slane %v1842_v46, 2 }
 0x368   : > { %1940 = vmatpush.msra.mxu3 %v1925_v36 }
 0x369   : > { %v1847_v61 = vadd.f32 %v3361_v48, %v3365_v31  ;;  %v1844_v15 = vadd.f32 %v1843_v9, %v1842_v46  ;;  %v2491_v9 = vld [vmem:[%s3467_s15] ss:$0 sm:$0xff] }
 0x36a   : > { %v1675_v12 = vpop.f32.mrf.mxu2 }
 0x36b   : > { %v1676_v25 = vadd.f32 %v2490_v59, %v1675_v12  ;;  %v1848_v37 = vrot.slane %v1847_v61, 4  ;;  %v1924_v12 = vld [vmem:[#allocation10 + $0x38] sm:$0xff] }
 0x36c   : > { %v1706_v13 = vpop.f32.mrf.mxu3  ;;  %1941 = vmatpush.msra.mxu3 %v1924_v12 }
 0x36d   : > { %v1735_v14 = vpop.f32.mrf.mxu0  ;;  %v1705_v21 = vadd.f32 %v1704_v27, %v1676_v25  ;;  %v1849_v44 = vadd.f32 %v1848_v37, %v1847_v61  ;;  %v1922_v25 = vld [vmem:[#allocation10 + $0x28] sm:$0xff] }
 0x36e   : > { %1942 = vmatpush.msra.mxu3 %v1923_v49  ;;  %v1918_v61 = vld [vmem:[#allocation10 + $0x8] sm:$0xff] }
 0x36f   : > { %v3371_v62 = vadd.f32 %v1733_v11, %v1705_v21  ;;  %v1850_v54 = vrot.slane %v1849_v44, 2 }
 0x370   : > { %1943 = vmatpush.msra.mxu3 %v1922_v25 }
 0x371   : > { %v1851_v7 = vadd.f32 %v1850_v54, %v1849_v44 }
 0x372   : > { %v1677_v29 = vpop.f32.mrf.mxu2  ;;  %1944 = vmatpush.msra.mxu3 %v1921_v16  ;;  %v2492_v16 = vld [vmem:[%s3509_s30] ss:$0 sm:$0xff] }
 0x373   : > { %v1678_v19 = vadd.f32 %v2490_v59, %v1677_v29  ;;  %v1852_v20 = vrot.slane %v1851_v7, 1  ;;  %v1920_v29 = vld [vmem:[#allocation10 + $0x18] sm:$0xff] }
 0x374   : > { %v1709_v34 = vpop.f32.mrf.mxu3  ;;  %1945 = vmatpush.msra.mxu3 %v1920_v29 }
 0x375   : > { %v1707_v42 = vadd.f32 %v1706_v13, %v1678_v19  ;;  %v1738_v38 = vpop.f32.mrf.mxu0  ;;  %v1845_v13 = vrot.slane %v1844_v15, 1  ;;  %v1853_v26 = vadd.f32 %v1852_v20, %v1851_v7  ;;  %v1919_v19 = vld [vmem:[#allocation10 + $0x10] sm:$0xff] }
 0x376   : > { %1946 = vmatpush.msra.mxu3 %v1919_v19 }
 0x377   : > { %v3373_v43 = vadd.f32 %v1735_v14, %v1707_v42  ;;  %v1846_v30 = vadd.f32 %v1845_v13, %v1844_v15  ;;  %v1869_v42 = vmul.f32 %v1853_v26, %v3213_v24 }
 0x378   : > { %1947 = vmatpush.msra.mxu3 %v1918_v61 }
 0x379   : > { %v1854_v33 = vadd.f32 %v3373_v43, %v3371_v62  ;;  %v1868_v41 = vmul.f32 %v1846_v30, %v3213_v24 }
 0x37a   : > { %v1680_v22 = vpop.f32.mrf.mxu2 }
 0x37b   : > { %v1855_v63 = vrot.slane %v1854_v33, 4  ;;  %v1681_v3 = vadd.f32 %v2490_v59, %v1680_v22 }
 0x37c   : > { %v1711_v56 = vpop.f32.mrf.mxu3 }
 0x37d   : > { %v1856_v45 = vadd.f32 %v1855_v63, %v1854_v33  ;;  %v1710_v35 = vadd.f32 %v1709_v34, %v1681_v3  ;;  %v1740_v51 = vpop.f32.mrf.mxu0  ;;  %v1917_v33 = vld [vmem:[#allocation10] sm:$0xff]  ;;  %v1892_v34 = vsel %vm1180_vm7, %v1869_v42, %v1868_v41  ;;  %v1820_v63 = vpop.f32.mrf.mxu1 }
 0x37e   : > { %1948 = vmatpush.msra.mxu3 %v1917_v33 }
 0x37f   : > { %v1857_v18 = vrot.slane %v1856_v45, 2  ;;  %v3379_v27 = vadd.f32 %v1738_v38, %v1710_v35 }
 0x381   : > { %v1858_v11 = vadd.f32 %v1857_v18, %v1856_v45 }
 0x382   : > { %v1682_v52 = vpop.f32.mrf.mxu2 }
 0x383   : > { %v1683_v28 = vadd.f32 %v2490_v59, %v1682_v52  ;;  %v1859_v58 = vrot.slane %v1858_v11, 1 }
 0x385   : > { %v1712_v0 = vadd.f32 %v1711_v56, %v1683_v28  ;;  %v1860_v14 = vadd.f32 %v1859_v58, %v1858_v11  ;;  %v1822_v38 = vpop.f32.mrf.mxu1 }
 0x387   : > { %v3381_v4 = vadd.f32 %v1740_v51, %v1712_v0  ;;  %v1870_v17 = vmul.f32 %v1860_v14, %v3213_v24  ;;  %v2489_v0 = vld [vmem:[%s3464_s12] ss:$0 sm:$0xff] }
 0x388   : > { %v1821_v12 = vadd.f32 %v2489_v0, %v1820_v63  ;;  %v1823_v58 = vadd.f32 %v2489_v0, %v1822_v38 }
 0x389   : > { %v1861_v59 = vadd.f32 %v3381_v4, %v3379_v27  ;;  %v1893_v22 = vsel %vm1182_vm11, %v1870_v17, %v1892_v34 }
 0x38b   : > { %v1862_v47 = vrot.slane %v1861_v59, 4 }
 0x38d   : > { %v1863_v8 = vadd.f32 %v1862_v47, %v1861_v59  ;;  %v1825_v39 = vpop.f32.mrf.mxu1 }
 0x38e   : > { %v1826_v25 = vadd.f32 %v2489_v0, %v1825_v39 }
 0x38f   : > { %v1864_v2 = vrot.slane %v1863_v8, 2 }
 0x391   : > { %v1865_v21 = vadd.f32 %v1864_v2, %v1863_v8 }
 0x393   : > { %v1866_v6 = vrot.slane %v1865_v21, 1 }
 0x395   : > { %v1867_v32 = vadd.f32 %v1866_v6, %v1865_v21  ;;  %v1827_v50 = vpop.f32.mrf.mxu1 }
 0x396   : > { %v1828_v13 = vadd.f32 %v2489_v0, %v1827_v50 }
 0x397   : > { %v1871_v40 = vmul.f32 %v1867_v32, %v3213_v24 }
 0x399   : > { %v1894_v60 = vsel %vm3508_vm0, %v1871_v40, %v1893_v22 }
 0x39a   : > { %1912 = vmatmul.f32.vlgmr.msra.gmra.mxu2 %v1894_v60 }
 0x39d   : > { %v1830_v44 = vpop.f32.mrf.mxu1 }
 0x39e   : > { %v1831_v8 = vadd.f32 %v2489_v0, %v1830_v44 }
 0x3a5   : > { %v1832_v46 = vpop.f32.mrf.mxu1 }
 0x3a6   : > { %v1833_v30 = vadd.f32 %v2489_v0, %v1832_v46 }
 0x3ad   : > { %v1835_v54 = vpop.f32.mrf.mxu1 }
 0x3ae   : > { %v1836_v21 = vadd.f32 %v2489_v0, %v1835_v54 }
 0x3b5   : > { %v1837_v15 = vpop.f32.mrf.mxu1 }
 0x3b6   : > { %v1838_v19 = vadd.f32 %v2489_v0, %v1837_v15 }
 0x41d   : > { %v1913_v10 = vpop.f32.mrf.mxu2 }
 0x41e   : > { %v1916_v37 = vmax.f32 %v1913_v10, 0.0 }
 0x420   : > { %1949 = vmatmul.f32.vlgmr.msra.gmra.mxu3 %v1916_v37 }
 0x4a3   : > { %v1950_v1 = vpop.f32.mrf.mxu3 }
 0x4a4   : > { %v2347_v3 = vmul.f32 -1.442695, %v1950_v1 }
 0x4a6   : > { %2499 = vpow2.f32 %v2347_v3 }
 0x4ac   : > { %v2500_v45 = vpop.eup %2499 }
 0x4ad   : > { %v1956_v23 = vadd.f32 1.0, %v2500_v45 }
 0x4af   : > { %2501 = vrcp.f32 %v1956_v23  ;;  %v1968_v28 = vand.u32 2147483648, %v1956_v23  ;;  %v1966_v56 = vand.u32 2147483647, %v1956_v23  ;;  %vm1962_vm2 = vweird.f32 %v1956_v23 }
 0x4b1   : > { %v1969_v51 = vor.u32 1.1754944e-38, %v1968_v28  ;;  %vm1967_vm4 = vcmp.eq.f32.partialorder %v1966_v56, 8.507059e+37 }
 0x4b5   : > { %v2502_v52 = vpop.eup %2501 }
 0x4b6   : > { %v1958_v53 = vmul.f32 %v2502_v52, %v1956_v23  ;;  %vm1963_vm1 = vweird.f32 %v2502_v52 }
 0x4b7   : > { %vm1964_vm3 = vmor %vm1962_vm2, %vm1963_vm1 }
 0x4b8   : > { %v1959_v35 = vsub.f32 1.0, %v1958_v53 }
 0x4ba   : > { %v1960_v18 = vmul.f32 %v2502_v52, %v1959_v35 }
 0x4bc   : > { %v1961_v57 = vadd.f32 %v2502_v52, %v1960_v18 }
 0x4be   : > { %v1965_v36 = vsel %vm1964_vm3, %v2502_v52, %v1961_v57 }
 0x4bf   : > { %v1970_v7 = vsel %vm1967_vm4, %v1969_v51, %v1965_v36 }
 0x4c0   : > { %v1976_v11 = vmul.f32 %v2491_v9, %v1970_v7 }
 0x4c2   : > { %v1978_v59 = vrot.slane %v1976_v11, 1  ;;  %v1979_v49 = vrot.slane %v1976_v11, 2  ;;  %v1980_v20 = vrot.slane %v1976_v11, 3  ;;  %v1981_v47 = vperm.slane %v1976_v11, 0 }
 0x4c4   : > { %v1982_v26 = vperm.slane %v1978_v59, 0  ;;  %v1983_v2 = vperm.slane %v1979_v49, 0  ;;  %v1984_v14 = vperm.slane %v1980_v20, 0  ;;  %v1989_v29 = vmul.f32 %v1981_v47, %v3367_v55 }
 0x4c5   : > { %v1990_v6 = vmul.f32 %v1981_v47, %v3363_v5 }
 0x4c6   : > { %v1991_v42 = vmul.f32 %v1982_v26, %v3365_v31  ;;  %v1992_v17 = vmul.f32 %v1982_v26, %v3361_v48  ;;  %v1993_v61 = vmul.f32 %v1983_v2, %v3371_v62  ;;  %v1994_v32 = vmul.f32 %v1983_v2, %v3373_v43 }
 0x4c7   : > { %v1995_v41 = vmul.f32 %v1984_v14, %v3379_v27  ;;  %v1996_v33 = vmul.f32 %v1984_v14, %v3381_v4  ;;  %v2001_v40 = vadd.f32 %v2492_v16, %v1989_v29  ;;  %v2002_v34 = vadd.f32 %v2492_v16, %v1990_v6 }
 0x4c8   : > { %v2003_v55 = vadd.f32 %v2492_v16, %v1991_v42  ;;  %v2004_v22 = vadd.f32 %v2492_v16, %v1992_v17  ;;  %v2005_v60 = vadd.f32 %v2492_v16, %v1993_v61  ;;  %v2006_v10 = vadd.f32 %v2492_v16, %v1994_v32 }
 0x4c9   : > { %v2007_v37 = vadd.f32 %v2492_v16, %v1995_v41  ;;  %v2008_v5 = vadd.f32 %v2492_v16, %v1996_v33  ;;  %v2009_v63 = vmax.f32 %v2001_v40, 0.0  ;;  %v2010_v31 = vmax.f32 %v2002_v34, 0.0 }
 0x4ca   : > { %v2011_v38 = vmax.f32 %v2003_v55, 0.0  ;;  %v2012_v48 = vmax.f32 %v2004_v22, 0.0  ;;  %v2013_v39 = vmax.f32 %v2005_v60, 0.0  ;;  %v2014_v62 = vmax.f32 %v2006_v10, 0.0 }
 0x4cb   : > { %v2015_v50 = vmax.f32 %v2007_v37, 0.0  ;;  %v2016_v43 = vmax.f32 %v2008_v5, 0.0  ;;  %v2017_v27 = vadd.f32 %v2009_v63, %v1821_v12  ;;  %v2018_v1 = vadd.f32 %v2010_v31, %v1823_v58 }
 0x4cc   : > { %v2019_v4 = vadd.f32 %v2011_v38, %v1826_v25  ;;  %v2020_v44 = vadd.f32 %v2012_v48, %v1828_v13  ;;  %v2021_v3 = vadd.f32 %v2013_v39, %v1831_v8  ;;  %v2022_v45 = vadd.f32 %v2014_v62, %v1833_v30 }
 0x4cd   : > { %v2023_v23 = vadd.f32 %v2015_v50, %v1836_v21  ;;  %v2024_v46 = vadd.f32 %v2016_v43, %v1838_v19  ;;  %v2025_v52 = vadd.f32 %v2018_v1, %v2017_v27 }
 0x4ce   : > { %v2032_v53 = vadd.f32 %v2020_v44, %v2019_v4  ;;  %v2039_v54 = vadd.f32 %v2022_v45, %v2021_v3 }
 0x4cf   : > { %v2026_v35 = vrot.slane %v2025_v52, 4  ;;  %v2046_v28 = vadd.f32 %v2024_v46, %v2023_v23 }
 0x4d0   : > { %v2033_v18 = vrot.slane %v2032_v53, 4  ;;  %v2040_v56 = vrot.slane %v2039_v54, 4 }
 0x4d1   : > { %v2027_v57 = vadd.f32 %v2026_v35, %v2025_v52  ;;  %v2047_v9 = vrot.slane %v2046_v28, 4 }
 0x4d2   : > { %v2034_v0 = vadd.f32 %v2033_v18, %v2032_v53  ;;  %v2041_v51 = vadd.f32 %v2040_v56, %v2039_v54 }
 0x4d3   : > { %v2028_v36 = vrot.slane %v2027_v57, 2  ;;  %v2048_v7 = vadd.f32 %v2047_v9, %v2046_v28 }
 0x4d4   : > { %v2035_v11 = vrot.slane %v2034_v0, 2  ;;  %v2042_v12 = vrot.slane %v2041_v51, 2 }
 0x4d5   : > { %v2029_v15 = vadd.f32 %v2028_v36, %v2027_v57  ;;  %v2049_v59 = vrot.slane %v2048_v7, 2 }
 0x4d6   : > { %v2036_v49 = vadd.f32 %v2035_v11, %v2034_v0  ;;  %v2043_v20 = vadd.f32 %v2042_v12, %v2041_v51 }
 0x4d7   : > { %v2030_v47 = vrot.slane %v2029_v15, 1  ;;  %v2050_v58 = vadd.f32 %v2049_v59, %v2048_v7 }
 0x4d8   : > { %v2037_v25 = vrot.slane %v2036_v49, 1  ;;  %v2044_v13 = vrot.slane %v2043_v20, 1 }
 0x4d9   : > { %v2031_v8 = vadd.f32 %v2030_v47, %v2029_v15  ;;  %v2051_v16 = vrot.slane %v2050_v58, 1 }
 0x4da   : > { %v2038_v26 = vadd.f32 %v2037_v25, %v2036_v49  ;;  %v2045_v2 = vadd.f32 %v2044_v13, %v2043_v20 }
 0x4db   : > { %v2052_v14 = vadd.f32 %v2051_v16, %v2050_v58  ;;  %v2053_v29 = vmul.f32 %v2031_v8, %v3213_v24 }
 0x4dc   : > { %v2054_v30 = vmul.f32 %v2038_v26, %v3213_v24  ;;  %v2055_v21 = vmul.f32 %v2045_v2, %v3213_v24 }
 0x4dd   : > { %v2056_v19 = vmul.f32 %v2052_v14, %v3213_v24  ;;  %2057 = vst [vmem:[%s627_s16] sm:$0x1] %v2053_v29 }
 0x4de   : > { %2058 = vst [vmem:[%s627_s16 + $0x1] sm:$0x1] %v2054_v30 }
 0x4df   : > { %2059 = vst [vmem:[%s627_s16 + $0x2] sm:$0x1] %v2055_v21 }
 0x4e0   : > { %2060 = vst [vmem:[%s627_s16 + $0x3] sm:$0x1] %v2056_v19 }
 0x4e1   : > { %2680 = shalt.err (!%p2677_p8)
}
 0x4e2   : > { %s2741_s26 = smov 16   ;;  %s2742_s29 = smov 1  }
 0x4e3   : > { %2406 = dma.vmem_to_hbm [thread:$0]  (%p2871_p5), %s2074_s17, 64, %s2076_s25, %s2062_s6, %s2741_s26, %s2741_s26, %s2742_s29  }
 0x4e4 PF: > { %s3514_s9 = sld [smem:[#allocation19_spill]] }
 0x4e5   : > { %s3515_s24 = sld [smem:[#allocation16_spill]] }
 0x4ea   : > { %p2438_p9 = scmp.ge.s32.totalorder %s3514_s9, 2 }
 0x4eb   : > { %s2090_s13 = sand.u32 1, %s3515_s24  }
 0x4ec   : > { %p2425_p10 = pnand %p2438_p9, %p2875_p6  ;;  %s2091_s16 = scalar_lea.sflag [#allocation4], %s2090_s13 }
 0x4ee   : > { %p2426_p11 = pneg %p2425_p10 }
 0x4f0   : > { %2710 = dma.done.wait (%p2426_p11), %s2091_s16, 64  }
 0x4f1   : > { %2712 = vsyncadd (%p2426_p11), %s2091_s16, 4294967232  ;;  %s3517_s27 = sld [smem:[#allocation20_spill]] }
 0x4f2   : > { %s3518_s24 = sld [smem:[#allocation17_spill]] }
 0x4f3   : > { %s3519_s25 = sld [smem:[#allocation18_spill]] }
 0x4f4   : > { %s3520_s26 = sld [smem:[#allocation21_spill]] }
 0x4f7   : > { %p30_p12 = scmp.ge.s32.totalorder %s3517_s27, 4  }
 0x4f9   :  { %32 = sbr.rel (!%p30_p12) target bundleno = 14 (0xe), region = 144 }
 0x4fe   :  { %2097 = vsyncpa [#allocation3], 1 }
 0x4ff   :  { %2099 = vsyncpa [#allocation3 + $0x1], 1 }
 0x500   :  { %2100 = vsyncpa [#allocation6], 1 }
 0x501   :  { %2101 = vsyncpa [#allocation9], 1 }
 0x502   :  { %2102 = vsyncpa [#allocation4], 1 }
 0x503   :  { %2104 = vsyncpa [#allocation4 + $0x1], 1 }

</bundles_post_ra>
